<compile_context>
chip_gen: v7x
topology: tpu7x:2x2x1
jax: 0.10.0
libtpu: 0.0.40
codegen_flags: <defaults>
</compile_context>

<pallas_src>
import functools

import jax
import jax.numpy as jnp
from jax.experimental import pallas as pl
from jax.experimental.pallas import tpu as pltpu


def _round_up(x, m):
    return (x + m - 1) // m * m


def _gelu_tanh(x):
    # tanh-approximate GELU (same formula is used in the reference below).
    c = 0.7978845608028654  # sqrt(2 / pi)
    return 0.5 * x * (1.0 + jnp.tanh(c * (x + 0.044715 * x * x * x)))


# ---------------------------------------------------------------------------
# Fused linear:  out = act(X @ W + b) [+ residual]
# ---------------------------------------------------------------------------
def _linear_epilogue(acc, b, activation):
    acc = acc + b
    if activation == "gelu":
        acc = _gelu_tanh(acc)
    return acc


def _linear_kernel(x_ref, w_ref, b_ref, o_ref, *, activation):
    acc = jnp.dot(x_ref[...], w_ref[...], preferred_element_type=jnp.float32)
    acc = _linear_epilogue(acc, b_ref[...].astype(jnp.float32), activation)
    o_ref[...] = acc.astype(o_ref.dtype)


def _linear_residual_kernel(x_ref, w_ref, b_ref, r_ref, o_ref, *, activation):
    acc = jnp.dot(x_ref[...], w_ref[...], preferred_element_type=jnp.float32)
    acc = _linear_epilogue(acc, b_ref[...].astype(jnp.float32), activation)
    acc = acc + r_ref[...].astype(jnp.float32)
    o_ref[...] = acc.astype(o_ref.dtype)


def pallas_linear(x, w, b, *, residual=None, activation=None,
                  out_dtype=jnp.float32, compute_dtype=jnp.bfloat16,
                  tm=1024, tn=None):
    """out = act(x @ w + b) (+ residual).  x: [M, K], w: [K, N], b: [N]."""
    M, K = x.shape
    K2, N = w.shape
    assert K == K2
    x = x.astype(compute_dtype)
    w = w.astype(compute_dtype)
    b2 = jnp.reshape(b, (1, N)).astype(jnp.float32)

    # Row tile: full M when it fits, else a sublane-aligned tile; the ragged
    # last tile is masked by Pallas (no jnp.pad pass over the activations).
    tm_eff = M if M <= tm else _round_up(min(tm, M), 8)
    # Column tile: keep the whole (K, N) weight slab VMEM-resident when
    # possible (n_tiles == 1); otherwise lane-aligned.
    if tn is None or tn >= N:
        tn_eff = N
    else:
        tn_eff = _round_up(tn, 128)
        if tn_eff >= N:
            tn_eff = N
    m_tiles = pl.cdiv(M, tm_eff)
    n_tiles = pl.cdiv(N, tn_eff)

    if n_tiles == 1:
        # 1-D grid over M only -> the v7x megacore split lands on M.
        grid = (m_tiles,)
        x_map = lambda i: (i, 0)
        w_map = lambda i: (0, 0)
        b_map = lambda i: (0, 0)
        o_map = lambda i: (i, 0)
        dims = ("parallel",)
    else:
        # N outer so the (K, tn) weight/bias slab changes least.
        grid = (n_tiles, m_tiles)
        x_map = lambda j, i: (i, 0)
        w_map = lambda j, i: (0, j)
        b_map = lambda j, i: (0, j)
        o_map = lambda j, i: (i, j)
        dims = ("parallel", "parallel")

    in_specs = [
        pl.BlockSpec((tm_eff, K), x_map),     # streaming activation tile
        pl.BlockSpec((K, tn_eff), w_map),     # VMEM-resident weight slab
        pl.BlockSpec((1, tn_eff), b_map),     # bias slab
    ]
    operands = [x, w, b2]
    if residual is not None:
        assert residual.shape == (M, N)
        in_specs.append(pl.BlockSpec((tm_eff, tn_eff), o_map))
        operands.append(residual)
        kernel = functools.partial(_linear_residual_kernel, activation=activation)
    else:
        kernel = functools.partial(_linear_kernel, activation=activation)

    # VMEM limit from the actual double-buffered footprint (+ headroom),
    # rather than a flat constant (stays well inside v7x's 64 MiB).
    csz = jnp.dtype(compute_dtype).itemsize
    osz = jnp.dtype(out_dtype).itemsize
    buf = 2 * (tm_eff * K * csz + K * tn_eff * csz + tn_eff * 4
               + tm_eff * tn_eff * osz)
    if residual is not None:
        buf += 2 * tm_eff * tn_eff * residual.dtype.itemsize
    vmem_limit = int(min(96 * 2 ** 20, max(32 * 2 ** 20, buf + (8 << 20))))

    bytes_accessed = (x.size * csz + w.size * csz + b2.size * 4 + M * N * osz
                      + (residual.size * residual.dtype.itemsize
                         if residual is not None else 0))

    return pl.pallas_call(
        kernel,
        out_shape=jax.ShapeDtypeStruct((M, N), out_dtype),
        grid_spec=pl.GridSpec(grid=grid, in_specs=in_specs,
                              out_specs=pl.BlockSpec((tm_eff, tn_eff), o_map)),
        compiler_params=pltpu.CompilerParams(
            dimension_semantics=dims, vmem_limit_bytes=vmem_limit),
        cost_estimate=pl.CostEstimate(
            flops=2 * M * K * N,
            transcendentals=(M * N if activation == "gelu" else 0),
            bytes_accessed=int(bytes_accessed)),
    )(*operands)


# ---------------------------------------------------------------------------
# LayerNorm over the last dim (f32 statistics, fused scale + shift)
# ---------------------------------------------------------------------------
def _layernorm_kernel(x_ref, g_ref, b_ref, o_ref, *, eps):
    x = x_ref[...].astype(jnp.float32)
    mu = jnp.mean(x, axis=-1, keepdims=True)
    xc = x - mu
    var = jnp.mean(xc * xc, axis=-1, keepdims=True)
    y = xc * jax.lax.rsqrt(var + eps)
    o_ref[...] = (y * g_ref[...] + b_ref[...]).astype(o_ref.dtype)


def pallas_layernorm(x, gamma, beta, *, eps=1e-6, out_dtype=jnp.float32, tm=1024):
    M, E = x.shape
    tm_eff = M if M <= tm else _round_up(min(tm, M), 8)
    grid = (pl.cdiv(M, tm_eff),)
    g2 = jnp.reshape(gamma, (1, E)).astype(jnp.float32)
    b2 = jnp.reshape(beta, (1, E)).astype(jnp.float32)
    row_spec = pl.BlockSpec((tm_eff, E), lambda i: (i, 0))
    vec_spec = pl.BlockSpec((1, E), lambda i: (0, 0))
    return pl.pallas_call(
        functools.partial(_layernorm_kernel, eps=eps),
        out_shape=jax.ShapeDtypeStruct((M, E), out_dtype),
        grid_spec=pl.GridSpec(grid=grid, in_specs=[row_spec, vec_spec, vec_spec],
                              out_specs=row_spec),
        compiler_params=pltpu.CompilerParams(dimension_semantics=("parallel",)),
    )(x, g2, b2)


# ---------------------------------------------------------------------------
# Attention core: per (batch*head) softmax(q k^T * scale) @ v
# ---------------------------------------------------------------------------
def _attention_kernel(q_ref, k_ref, v_ref, o_ref, *, scale):
    q = q_ref[0].astype(jnp.float32)            # (N, Dh)
    k = k_ref[0].astype(jnp.float32)            # (N, Dh)
    v = v_ref[0]                                 # (N, Dh)
    s = jax.lax.dot_general(q, k, (((1,), (1,)), ((), ())),
                            preferred_element_type=jnp.float32) * scale
    s = s - jnp.max(s, axis=-1, keepdims=True)
    p = jnp.exp(s)
    p = p / jnp.sum(p, axis=-1, keepdims=True)
    o = jnp.dot(p.astype(v.dtype), v, preferred_element_type=jnp.float32)
    o_ref[0] = o.astype(o_ref.dtype)


def pallas_attention(q, k, v, *, scale, out_dtype=jnp.bfloat16):
    BH, N, Dh = q.shape
    spec = pl.BlockSpec((1, N, Dh), lambda i: (i, 0, 0))
    return pl.pallas_call(
        functools.partial(_attention_kernel, scale=scale),
        out_shape=jax.ShapeDtypeStruct((BH, N, Dh), out_dtype),
        grid_spec=pl.GridSpec(grid=(BH,), in_specs=[spec, spec, spec],
                              out_specs=spec),
        compiler_params=pltpu.CompilerParams(dimension_semantics=("parallel",)),
    )(q, k, v)


# ---------------------------------------------------------------------------
# VisionTransformer forward (Pallas kernels + thin JAX layout plumbing)
# ---------------------------------------------------------------------------
def vit_forward(x, params, cfg, *, compute_dtype=jnp.bfloat16, tm=1024):
    B, C, H, W = x.shape
    ps = cfg["patch_size"]
    E = cfg["embed_dim"]
    nh = cfg["num_heads"]
    Dh = E // nh
    gh, gw = H // ps, W // ps
    P = gh * gw
    scale = Dh ** -0.5

    # --- patch embed: Conv2d(kernel==stride) == patch matmul ----------------
    # Cast BEFORE the patchify transpose so XLA fuses the cast into the
    # unavoidable NCHW -> [M, K] copy at half the bytes.
    xp = x.astype(compute_dtype)
    xp = xp.reshape(B, C, gh, ps, gw, ps)
    xp = jnp.transpose(xp, (0, 2, 4, 1, 3, 5)).reshape(B * P, C * ps * ps)
    tok = pallas_linear(xp, params["w_patch"], params["b_patch"],
                        out_dtype=jnp.float32, compute_dtype=compute_dtype, tm=tm)
    tok = tok.reshape(B, P, E)

    # cls token + positional embedding (tiny elementwise; pos_drop = identity)
    cls = jnp.broadcast_to(params["cls_token"].astype(jnp.float32), (B, 1, E))
    h = jnp.concatenate([cls, tok], axis=1) + params["pos_embed"].astype(jnp.float32)
    N = P + 1
    h = h.reshape(B * N, E)                      # f32 residual stream

    for blk in params["blocks"]:
        # ----- attention branch -----
        y = pallas_layernorm(h, blk["ln1_g"], blk["ln1_b"],
                             out_dtype=compute_dtype, tm=tm)
        qkv = pallas_linear(y, blk["w_qkv"], blk["b_qkv"],
                            out_dtype=compute_dtype, compute_dtype=compute_dtype,
                            tm=tm)
        qkv = qkv.reshape(B, N, 3, nh, Dh)
        q = jnp.transpose(qkv[:, :, 0], (0, 2, 1, 3)).reshape(B * nh, N, Dh)
        k = jnp.transpose(qkv[:, :, 1], (0, 2, 1, 3)).reshape(B * nh, N, Dh)
        v = jnp.transpose(qkv[:, :, 2], (0, 2, 1, 3)).reshape(B * nh, N, Dh)
        a = pallas_attention(q, k, v, scale=scale, out_dtype=compute_dtype)
        a = jnp.transpose(a.reshape(B, nh, N, Dh), (0, 2, 1, 3)).reshape(B * N, E)
        h = pallas_linear(a, blk["w_proj"], blk["b_proj"], residual=h,
                          out_dtype=jnp.float32, compute_dtype=compute_dtype,
                          tm=tm)
        # ----- MLP branch -----
        y = pallas_layernorm(h, blk["ln2_g"], blk["ln2_b"],
                             out_dtype=compute_dtype, tm=tm)
        z = pallas_linear(y, blk["w_fc1"], blk["b_fc1"], activation="gelu",
                          out_dtype=compute_dtype, compute_dtype=compute_dtype,
                          tm=tm)
        h = pallas_linear(z, blk["w_fc2"], blk["b_fc2"], residual=h,
                          out_dtype=jnp.float32, compute_dtype=compute_dtype,
                          tm=tm)

    h = pallas_layernorm(h, params["norm_g"], params["norm_b"],
                         out_dtype=jnp.float32, tm=tm)
    cls_out = h.reshape(B, N, E)[:, 0]           # pre_logits = Identity
    logits = pallas_linear(cls_out, params["w_head"], params["b_head"],
                           out_dtype=jnp.float32, compute_dtype=compute_dtype,
                           tm=tm)
    return logits


# ---------------------------------------------------------------------------
# Parameter init (weights stored in matmul layout [in, out]) and pure-JAX ref
# ---------------------------------------------------------------------------
def init_vit_params(key, *, img_size, patch_size, in_c, embed_dim, depth,
                    num_heads, mlp_ratio, num_classes):
    del num_heads  # head count only matters in the forward
    hidden = int(embed_dim * mlp_ratio)
    K = in_c * patch_size * patch_size
    num_patches = (img_size // patch_size) ** 2
    keys = iter(jax.random.split(key, 8 + depth * 12))

    def nrm(shape, std=0.02):
        return jax.random.normal(next(keys), shape, dtype=jnp.float32) * std

    params = {
        # Conv2d weight pre-reshaped to matmul layout [K, E] (kernel==stride).
        "w_patch": nrm((K, embed_dim)),
        "b_patch": nrm((embed_dim,)),
        "cls_token": nrm((1, 1, embed_dim)),
        "pos_embed": nrm((1, num_patches + 1, embed_dim)),
        "blocks": [],
        "norm_g": 1.0 + nrm((embed_dim,), 0.05),
        "norm_b": nrm((embed_dim,), 0.05),
        "w_head": nrm((embed_dim, num_classes), 0.01),
        "b_head": nrm((num_classes,), 0.01),
    }
    for _ in range(depth):
        params["blocks"].append({
            "ln1_g": 1.0 + nrm((embed_dim,), 0.05),
            "ln1_b": nrm((embed_dim,), 0.05),
            "w_qkv": nrm((embed_dim, 3 * embed_dim), 0.01),
            "b_qkv": nrm((3 * embed_dim,), 0.01),
            "w_proj": nrm((embed_dim, embed_dim), 0.01),
            "b_proj": nrm((embed_dim,), 0.01),
            "ln2_g": 1.0 + nrm((embed_dim,), 0.05),
            "ln2_b": nrm((embed_dim,), 0.05),
            "w_fc1": nrm((embed_dim, hidden), 0.01),
            "b_fc1": nrm((hidden,), 0.01),
            "w_fc2": nrm((hidden, embed_dim), 0.01),
            "b_fc2": nrm((embed_dim,), 0.01),
        })
    return params


def _layernorm_ref(x, g, b, eps=1e-6):
    mu = jnp.mean(x, axis=-1, keepdims=True)
    xc = x - mu
    var = jnp.mean(xc * xc, axis=-1, keepdims=True)
    return xc * jax.lax.rsqrt(var + eps) * g + b


def vit_forward_reference(x, params, cfg):
    """Pure-JAX f32 reference with identical math (inference semantics)."""
    B, C, H, W = x.shape
    ps = cfg["patch_size"]
    E = cfg["embed_dim"]
    nh = cfg["num_heads"]
    Dh = E // nh
    gh, gw = H // ps, W // ps
    P = gh * gw
    scale = Dh ** -0.5

    xp = x.reshape(B, C, gh, ps, gw, ps)
    xp = jnp.transpose(xp, (0, 2, 4, 1, 3, 5)).reshape(B * P, C * ps * ps)
    tok = (xp @ params["w_patch"] + params["b_patch"]).reshape(B, P, E)
    cls = jnp.broadcast_to(params["cls_token"], (B, 1, E))
    h = jnp.concatenate([cls, tok], axis=1) + params["pos_embed"]
    N = P + 1
    for blk in params["blocks"]:
        y = _layernorm_ref(h, blk["ln1_g"], blk["ln1_b"])
        qkv = (y @ blk["w_qkv"] + blk["b_qkv"]).reshape(B, N, 3, nh, Dh)
        q = jnp.transpose(qkv[:, :, 0], (0, 2, 1, 3))
        k = jnp.transpose(qkv[:, :, 1], (0, 2, 1, 3))
        v = jnp.transpose(qkv[:, :, 2], (0, 2, 1, 3))
        s = jnp.einsum("bhqd,bhkd->bhqk", q, k) * scale
        s = s - jnp.max(s, axis=-1, keepdims=True)
        p = jnp.exp(s)
        p = p / jnp.sum(p, axis=-1, keepdims=True)
        a = jnp.einsum("bhqk,bhkd->bhqd", p, v)
        a = jnp.transpose(a, (0, 2, 1, 3)).reshape(B, N, E)
        h = h + (a @ blk["w_proj"] + blk["b_proj"])
        y = _layernorm_ref(h, blk["ln2_g"], blk["ln2_b"])
        z = _gelu_tanh(y @ blk["w_fc1"] + blk["b_fc1"])
        h = h + (z @ blk["w_fc2"] + blk["b_fc2"])
    h = _layernorm_ref(h, params["norm_g"], params["norm_b"])
    return h[:, 0] @ params["w_head"] + params["b_head"]


if __name__ == "__main__":
    # Small shapes consistent with the module: img_size=16, patch_size=4,
    # in_c=4, embed_dim=32, depth=2, num_heads=4, num_classes=10.
    cfg = dict(img_size=16, patch_size=4, in_c=4, embed_dim=32, depth=2,
               num_heads=4, mlp_ratio=4.0, num_classes=10)
    B = 2

    key = jax.random.PRNGKey(0)
    kx, kp = jax.random.split(key)
    x = jax.random.normal(
        kx, (B, cfg["in_c"], cfg["img_size"], cfg["img_size"]), dtype=jnp.float32)
    params = init_vit_params(kp, **cfg)

    ref = vit_forward_reference(x, params, cfg)

    # f32-compute run (tight check against the pure-JAX reference).
    fwd_f32 = jax.jit(functools.partial(vit_forward, cfg=cfg,
                                        compute_dtype=jnp.float32))
    out_f32 = jax.block_until_ready(fwd_f32(x, params))
    assert out_f32.shape == (B, cfg["num_classes"])
    assert jnp.allclose(out_f32, ref, atol=5e-3, rtol=5e-3), \
        float(jnp.max(jnp.abs(out_f32 - ref)))

    # Default bf16-operand run (production configuration, loose tolerance).
    fwd_bf16 = jax.jit(functools.partial(vit_forward, cfg=cfg))
    out_bf16 = jax.block_until_ready(fwd_bf16(x, params))
    assert out_bf16.shape == (B, cfg["num_classes"])
    assert jnp.allclose(out_bf16, ref, atol=5e-2, rtol=5e-2), \
        float(jnp.max(jnp.abs(out_bf16 - ref)))

    print("KERNEL_OK")
</pallas_src>

<mosaic_0001>
module attributes {stable_mosaic.version = 11 : i64} {
  func.func @_linear_kernel(%arg0: i32, %arg1: memref<32x64xf32, #tpu.memory_space<vmem>>, %arg2: memref<64x32xf32, #tpu.memory_space<vmem>>, %arg3: memref<1x32xf32, #tpu.memory_space<vmem>>, %arg4: memref<32x32xf32, #tpu.memory_space<vmem>>) attributes {dimension_semantics = [#tpu.dimension_semantics<parallel>], iteration_bounds = array<i64: 1>, scalar_prefetch = 0 : i64, scratch_operands = 0 : i64, tpu.core_type = #tpu.core_type<tc>, window_params = [{transform_indices = @transform_0, window_bounds = array<i64: 32, 64>}, {pipeline_mode = #tpu.pipeline_mode<synchronous>, transform_indices = @transform_1, window_bounds = array<i64: 64, 32>}, {pipeline_mode = #tpu.pipeline_mode<synchronous>, transform_indices = @transform_2, window_bounds = array<i64: 1, 32>}, {transform_indices = @transform_3, window_bounds = array<i64: 32, 32>}]} {
    %c0 = arith.constant 0 : index
    %c0_0 = arith.constant 0 : index
    %0 = vector.load %arg1[%c0, %c0_0] : memref<32x64xf32, #tpu.memory_space<vmem>>, vector<32x64xf32>
    %c0_1 = arith.constant 0 : index
    %c0_2 = arith.constant 0 : index
    %1 = vector.load %arg2[%c0_1, %c0_2] : memref<64x32xf32, #tpu.memory_space<vmem>>, vector<64x32xf32>
    %cst = arith.constant dense<0.000000e+00> : vector<32x32xf32>
    %2 = tpu.matmul %0, %1, %cst {dimension_numbers = #tpu.dot_dimension_numbers<[1], [0], [0], [1], [0, 0, 1, 1], [], []>} : vector<32x64xf32>, vector<64x32xf32>, vector<32x32xf32> -> vector<32x32xf32>
    %c0_3 = arith.constant 0 : index
    %c0_4 = arith.constant 0 : index
    %3 = vector.load %arg3[%c0_3, %c0_4] : memref<1x32xf32, #tpu.memory_space<vmem>>, vector<1x32xf32>
    %4 = vector.broadcast %3 : vector<1x32xf32> to vector<32x32xf32>
    %5 = arith.addf %2, %4 : vector<32x32xf32>
    %c0_5 = arith.constant 0 : index
    %c0_6 = arith.constant 0 : index
    %6 = vector.load %arg4[%c0_5, %c0_6] : memref<32x32xf32, #tpu.memory_space<vmem>>, vector<32x32xf32>
    tpu.vector_store %arg4[%c0_5, %c0_6], %5 {strides = array<i32>} : memref<32x32xf32, #tpu.memory_space<vmem>>, vector<32x32xf32>,
    return
  }
  func.func @transform_0(%arg0: i32) -> (i32, i32) {
    %c0_i32 = arith.constant 0 : i32
    %c0_i32_0 = arith.constant 0 : i32
    return %arg0, %c0_i32 : i32, i32
  }
  func.func @transform_1(%arg0: i32) -> (i32, i32) {
    %c0_i32 = arith.constant 0 : i32
    %c0_i32_0 = arith.constant 0 : i32
    %c0_i32_1 = arith.constant 0 : i32
    return %c0_i32, %c0_i32_0 : i32, i32
  }
  func.func @transform_2(%arg0: i32) -> (i32, i32) {
    %c0_i32 = arith.constant 0 : i32
    %c0_i32_0 = arith.constant 0 : i32
    %c0_i32_1 = arith.constant 0 : i32
    return %c0_i32, %c0_i32_0 : i32, i32
  }
  func.func @transform_3(%arg0: i32) -> (i32, i32) {
    %c0_i32 = arith.constant 0 : i32
    %c0_i32_0 = arith.constant 0 : i32
    return %arg0, %c0_i32 : i32, i32
  }
}

module attributes {stable_mosaic.version = 11 : i64} {
  func.func @_layernorm_kernel(%arg0: i32, %arg1: memref<34x32xf32, #tpu.memory_space<vmem>>, %arg2: memref<1x32xf32, #tpu.memory_space<vmem>>, %arg3: memref<1x32xf32, #tpu.memory_space<vmem>>, %arg4: memref<34x32xf32, #tpu.memory_space<vmem>>) attributes {dimension_semantics = [#tpu.dimension_semantics<parallel>], iteration_bounds = array<i64: 1>, scalar_prefetch = 0 : i64, scratch_operands = 0 : i64, tpu.core_type = #tpu.core_type<tc>, window_params = [{transform_indices = @transform_0, window_bounds = array<i64: 34, 32>}, {pipeline_mode = #tpu.pipeline_mode<synchronous>, transform_indices = @transform_1, window_bounds = array<i64: 1, 32>}, {pipeline_mode = #tpu.pipeline_mode<synchronous>, transform_indices = @transform_2, window_bounds = array<i64: 1, 32>}, {transform_indices = @transform_3, window_bounds = array<i64: 34, 32>}]} {
    %c0 = arith.constant 0 : index
    %c0_0 = arith.constant 0 : index
    %0 = vector.load %arg1[%c0, %c0_0] : memref<34x32xf32, #tpu.memory_space<vmem>>, vector<34x32xf32>
    %cst = arith.constant dense<0.000000e+00> : vector<34xf32>
    %1 = vector.multi_reduction <add>, %0, %cst [1] : vector<34x32xf32> to vector<34xf32>
    %2 = vector.shape_cast %1 : vector<34xf32> to vector<34x1xf32>
    %cst_1 = arith.constant 3.200000e+01 : f32
    %3 = vector.broadcast %cst_1 : f32 to vector<34x1xf32>
    %4 = arith.divf %2, %3 : vector<34x1xf32>
    %5 = vector.broadcast %4 : vector<34x1xf32> to vector<34x32xf32>
    %6 = arith.subf %0, %5 : vector<34x32xf32>
    %7 = arith.mulf %6, %6 : vector<34x32xf32>
    %cst_2 = arith.constant dense<0.000000e+00> : vector<34xf32>
    %8 = vector.multi_reduction <add>, %7, %cst_2 [1] : vector<34x32xf32> to vector<34xf32>
    %9 = vector.shape_cast %8 : vector<34xf32> to vector<34x1xf32>
    %cst_3 = arith.constant 3.200000e+01 : f32
    %10 = vector.broadcast %cst_3 : f32 to vector<34x1xf32>
    %11 = arith.divf %9, %10 : vector<34x1xf32>
    %cst_4 = arith.constant 9.99999997E-7 : f32
    %12 = vector.broadcast %cst_4 : f32 to vector<34x1xf32>
    %13 = arith.addf %11, %12 : vector<34x1xf32>
    %14 = math.rsqrt %13 : vector<34x1xf32>
    %15 = vector.broadcast %14 : vector<34x1xf32> to vector<34x32xf32>
    %16 = arith.mulf %6, %15 : vector<34x32xf32>
    %c0_5 = arith.constant 0 : index
    %c0_6 = arith.constant 0 : index
    %17 = vector.load %arg2[%c0_5, %c0_6] : memref<1x32xf32, #tpu.memory_space<vmem>>, vector<1x32xf32>
    %18 = vector.broadcast %17 : vector<1x32xf32> to vector<34x32xf32>
    %19 = arith.mulf %16, %18 : vector<34x32xf32>
    %c0_7 = arith.constant 0 : index
    %c0_8 = arith.constant 0 : index
    %20 = vector.load %arg3[%c0_7, %c0_8] : memref<1x32xf32, #tpu.memory_space<vmem>>, vector<1x32xf32>
    %21 = vector.broadcast %20 : vector<1x32xf32> to vector<34x32xf32>
    %22 = arith.addf %19, %21 : vector<34x32xf32>
    %c0_9 = arith.constant 0 : index
    %c0_10 = arith.constant 0 : index
    %23 = vector.load %arg4[%c0_9, %c0_10] : memref<34x32xf32, #tpu.memory_space<vmem>>, vector<34x32xf32>
    tpu.vector_store %arg4[%c0_9, %c0_10], %22 {strides = array<i32>} : memref<34x32xf32, #tpu.memory_space<vmem>>, vector<34x32xf32>,
    return
  }
  func.func @transform_0(%arg0: i32) -> (i32, i32) {
    %c0_i32 = arith.constant 0 : i32
    %c0_i32_0 = arith.constant 0 : i32
    return %arg0, %c0_i32 : i32, i32
  }
  func.func @transform_1(%arg0: i32) -> (i32, i32) {
    %c0_i32 = arith.constant 0 : i32
    %c0_i32_0 = arith.constant 0 : i32
    %c0_i32_1 = arith.constant 0 : i32
    return %c0_i32, %c0_i32_0 : i32, i32
  }
  func.func @transform_2(%arg0: i32) -> (i32, i32) {
    %c0_i32 = arith.constant 0 : i32
    %c0_i32_0 = arith.constant 0 : i32
    %c0_i32_1 = arith.constant 0 : i32
    return %c0_i32, %c0_i32_0 : i32, i32
  }
  func.func @transform_3(%arg0: i32) -> (i32, i32) {
    %c0_i32 = arith.constant 0 : i32
    %c0_i32_0 = arith.constant 0 : i32
    return %arg0, %c0_i32 : i32, i32
  }
}

module attributes {stable_mosaic.version = 11 : i64} {
  func.func @_linear_kernel(%arg0: i32, %arg1: memref<34x32xf32, #tpu.memory_space<vmem>>, %arg2: memref<32x96xf32, #tpu.memory_space<vmem>>, %arg3: memref<1x96xf32, #tpu.memory_space<vmem>>, %arg4: memref<34x96xf32, #tpu.memory_space<vmem>>) attributes {dimension_semantics = [#tpu.dimension_semantics<parallel>], iteration_bounds = array<i64: 1>, scalar_prefetch = 0 : i64, scratch_operands = 0 : i64, tpu.core_type = #tpu.core_type<tc>, window_params = [{transform_indices = @transform_0, window_bounds = array<i64: 34, 32>}, {pipeline_mode = #tpu.pipeline_mode<synchronous>, transform_indices = @transform_1, window_bounds = array<i64: 32, 96>}, {pipeline_mode = #tpu.pipeline_mode<synchronous>, transform_indices = @transform_2, window_bounds = array<i64: 1, 96>}, {transform_indices = @transform_3, window_bounds = array<i64: 34, 96>}]} {
    %c0 = arith.constant 0 : index
    %c0_0 = arith.constant 0 : index
    %0 = vector.load %arg1[%c0, %c0_0] : memref<34x32xf32, #tpu.memory_space<vmem>>, vector<34x32xf32>
    %c0_1 = arith.constant 0 : index
    %c0_2 = arith.constant 0 : index
    %1 = vector.load %arg2[%c0_1, %c0_2] : memref<32x96xf32, #tpu.memory_space<vmem>>, vector<32x96xf32>
    %cst = arith.constant dense<0.000000e+00> : vector<34x96xf32>
    %2 = tpu.matmul %0, %1, %cst {dimension_numbers = #tpu.dot_dimension_numbers<[1], [0], [0], [1], [0, 0, 1, 1], [], []>} : vector<34x32xf32>, vector<32x96xf32>, vector<34x96xf32> -> vector<34x96xf32>
    %c0_3 = arith.constant 0 : index
    %c0_4 = arith.constant 0 : index
    %3 = vector.load %arg3[%c0_3, %c0_4] : memref<1x96xf32, #tpu.memory_space<vmem>>, vector<1x96xf32>
    %4 = vector.broadcast %3 : vector<1x96xf32> to vector<34x96xf32>
    %5 = arith.addf %2, %4 : vector<34x96xf32>
    %c0_5 = arith.constant 0 : index
    %c0_6 = arith.constant 0 : index
    %6 = vector.load %arg4[%c0_5, %c0_6] : memref<34x96xf32, #tpu.memory_space<vmem>>, vector<34x96xf32>
    tpu.vector_store %arg4[%c0_5, %c0_6], %5 {strides = array<i32>} : memref<34x96xf32, #tpu.memory_space<vmem>>, vector<34x96xf32>,
    return
  }
  func.func @transform_0(%arg0: i32) -> (i32, i32) {
    %c0_i32 = arith.constant 0 : i32
    %c0_i32_0 = arith.constant 0 : i32
    return %arg0, %c0_i32 : i32, i32
  }
  func.func @transform_1(%arg0: i32) -> (i32, i32) {
    %c0_i32 = arith.constant 0 : i32
    %c0_i32_0 = arith.constant 0 : i32
    %c0_i32_1 = arith.constant 0 : i32
    return %c0_i32, %c0_i32_0 : i32, i32
  }
  func.func @transform_2(%arg0: i32) -> (i32, i32) {
    %c0_i32 = arith.constant 0 : i32
    %c0_i32_0 = arith.constant 0 : i32
    %c0_i32_1 = arith.constant 0 : i32
    return %c0_i32, %c0_i32_0 : i32, i32
  }
  func.func @transform_3(%arg0: i32) -> (i32, i32) {
    %c0_i32 = arith.constant 0 : i32
    %c0_i32_0 = arith.constant 0 : i32
    return %arg0, %c0_i32 : i32, i32
  }
}

module attributes {stable_mosaic.version = 11 : i64} {
  func.func @_attention_kernel(%arg0: i32, %arg1: memref<1x17x8xf32, #tpu.memory_space<vmem>>, %arg2: memref<1x17x8xf32, #tpu.memory_space<vmem>>, %arg3: memref<1x17x8xf32, #tpu.memory_space<vmem>>, %arg4: memref<1x17x8xf32, #tpu.memory_space<vmem>>) attributes {dimension_semantics = [#tpu.dimension_semantics<parallel>], iteration_bounds = array<i64: 8>, scalar_prefetch = 0 : i64, scratch_operands = 0 : i64, tpu.core_type = #tpu.core_type<tc>, window_params = [{transform_indices = @transform_0, window_bounds = array<i64: 1, 17, 8>}, {transform_indices = @transform_1, window_bounds = array<i64: 1, 17, 8>}, {transform_indices = @transform_2, window_bounds = array<i64: 1, 17, 8>}, {transform_indices = @transform_3, window_bounds = array<i64: 1, 17, 8>}]} {
    %c0 = arith.constant 0 : index
    %c0_0 = arith.constant 0 : index
    %c0_1 = arith.constant 0 : index
    %0 = vector.load %arg1[%c0, %c0_0, %c0_1] : memref<1x17x8xf32, #tpu.memory_space<vmem>>, vector<1x17x8xf32>
    %1 = vector.shape_cast %0 : vector<1x17x8xf32> to vector<17x8xf32>
    %c0_2 = arith.constant 0 : index
    %c0_3 = arith.constant 0 : index
    %c0_4 = arith.constant 0 : index
    %2 = vector.load %arg2[%c0_2, %c0_3, %c0_4] : memref<1x17x8xf32, #tpu.memory_space<vmem>>, vector<1x17x8xf32>
    %3 = vector.shape_cast %2 : vector<1x17x8xf32> to vector<17x8xf32>
    %c0_5 = arith.constant 0 : index
    %c0_6 = arith.constant 0 : index
    %c0_7 = arith.constant 0 : index
    %4 = vector.load %arg3[%c0_5, %c0_6, %c0_7] : memref<1x17x8xf32, #tpu.memory_space<vmem>>, vector<1x17x8xf32>
    %5 = vector.shape_cast %4 : vector<1x17x8xf32> to vector<17x8xf32>
    %cst = arith.constant dense<0.000000e+00> : vector<17x17xf32>
    %6 = tpu.matmul %1, %3, %cst {dimension_numbers = #tpu.dot_dimension_numbers<[1], [1], [0], [0], [0, 0, 1, 0], [], []>} : vector<17x8xf32>, vector<17x8xf32>, vector<17x17xf32> -> vector<17x17xf32>
    %cst_8 = arith.constant 0.353553385 : f32
    %7 = vector.broadcast %cst_8 : f32 to vector<17x17xf32>
    %8 = arith.mulf %6, %7 : vector<17x17xf32>
    %cst_9 = arith.constant dense<0xFF800000> : vector<17xf32>
    %9 = vector.multi_reduction <maximumf>, %8, %cst_9 [1] : vector<17x17xf32> to vector<17xf32>
    %10 = vector.shape_cast %9 : vector<17xf32> to vector<17x1xf32>
    %11 = vector.broadcast %10 : vector<17x1xf32> to vector<17x17xf32>
    %12 = arith.subf %8, %11 : vector<17x17xf32>
    %13 = math.exp %12 : vector<17x17xf32>
    %cst_10 = arith.constant dense<0.000000e+00> : vector<17xf32>
    %14 = vector.multi_reduction <add>, %13, %cst_10 [1] : vector<17x17xf32> to vector<17xf32>
    %15 = vector.shape_cast %14 : vector<17xf32> to vector<17x1xf32>
    %16 = vector.broadcast %15 : vector<17x1xf32> to vector<17x17xf32>
    %17 = arith.divf %13, %16 : vector<17x17xf32>
    %cst_11 = arith.constant dense<0.000000e+00> : vector<17x8xf32>
    %18 = tpu.matmul %17, %5, %cst_11 {dimension_numbers = #tpu.dot_dimension_numbers<[1], [0], [0], [1], [0, 0, 1, 1], [], []>} : vector<17x17xf32>, vector<17x8xf32>, vector<17x8xf32> -> vector<17x8xf32>
    %c0_12 = arith.constant 0 : index
    %c0_13 = arith.constant 0 : index
    %c0_14 = arith.constant 0 : index
    %19 = vector.load %arg4[%c0_12, %c0_13, %c0_14] : memref<1x17x8xf32, #tpu.memory_space<vmem>>, vector<1x17x8xf32>
    %20 = vector.shape_cast %19 : vector<1x17x8xf32> to vector<17x8xf32>
    %21 = vector.shape_cast %18 : vector<17x8xf32> to vector<1x17x8xf32>
    tpu.vector_store %arg4[%c0_12, %c0_13, %c0_14], %21 {strides = array<i32>} : memref<1x17x8xf32, #tpu.memory_space<vmem>>, vector<1x17x8xf32>,
    return
  }
  func.func @transform_0(%arg0: i32) -> (i32, i32, i32) {
    %c0_i32 = arith.constant 0 : i32
    %c0_i32_0 = arith.constant 0 : i32
    %c0_i32_1 = arith.constant 0 : i32
    return %arg0, %c0_i32, %c0_i32_0 : i32, i32, i32
  }
  func.func @transform_1(%arg0: i32) -> (i32, i32, i32) {
    %c0_i32 = arith.constant 0 : i32
    %c0_i32_0 = arith.constant 0 : i32
    %c0_i32_1 = arith.constant 0 : i32
    return %arg0, %c0_i32, %c0_i32_0 : i32, i32, i32
  }
  func.func @transform_2(%arg0: i32) -> (i32, i32, i32) {
    %c0_i32 = arith.constant 0 : i32
    %c0_i32_0 = arith.constant 0 : i32
    %c0_i32_1 = arith.constant 0 : i32
    return %arg0, %c0_i32, %c0_i32_0 : i32, i32, i32
  }
  func.func @transform_3(%arg0: i32) -> (i32, i32, i32) {
    %c0_i32 = arith.constant 0 : i32
    %c0_i32_0 = arith.constant 0 : i32
    %c0_i32_1 = arith.constant 0 : i32
    return %arg0, %c0_i32, %c0_i32_0 : i32, i32, i32
  }
}

module attributes {stable_mosaic.version = 11 : i64} {
  func.func @_linear_residual_kernel(%arg0: i32, %arg1: memref<34x32xf32, #tpu.memory_space<vmem>>, %arg2: memref<32x32xf32, #tpu.memory_space<vmem>>, %arg3: memref<1x32xf32, #tpu.memory_space<vmem>>, %arg4: memref<34x32xf32, #tpu.memory_space<vmem>>, %arg5: memref<34x32xf32, #tpu.memory_space<vmem>>) attributes {dimension_semantics = [#tpu.dimension_semantics<parallel>], iteration_bounds = array<i64: 1>, scalar_prefetch = 0 : i64, scratch_operands = 0 : i64, tpu.core_type = #tpu.core_type<tc>, window_params = [{transform_indices = @transform_0, window_bounds = array<i64: 34, 32>}, {pipeline_mode = #tpu.pipeline_mode<synchronous>, transform_indices = @transform_1, window_bounds = array<i64: 32, 32>}, {pipeline_mode = #tpu.pipeline_mode<synchronous>, transform_indices = @transform_2, window_bounds = array<i64: 1, 32>}, {transform_indices = @transform_3, window_bounds = array<i64: 34, 32>}, {transform_indices = @transform_4, window_bounds = array<i64: 34, 32>}]} {
    %c0 = arith.constant 0 : index
    %c0_0 = arith.constant 0 : index
    %0 = vector.load %arg1[%c0, %c0_0] : memref<34x32xf32, #tpu.memory_space<vmem>>, vector<34x32xf32>
    %c0_1 = arith.constant 0 : index
    %c0_2 = arith.constant 0 : index
    %1 = vector.load %arg2[%c0_1, %c0_2] : memref<32x32xf32, #tpu.memory_space<vmem>>, vector<32x32xf32>
    %cst = arith.constant dense<0.000000e+00> : vector<34x32xf32>
    %2 = tpu.matmul %0, %1, %cst {dimension_numbers = #tpu.dot_dimension_numbers<[1], [0], [0], [1], [0, 0, 1, 1], [], []>} : vector<34x32xf32>, vector<32x32xf32>, vector<34x32xf32> -> vector<34x32xf32>
    %c0_3 = arith.constant 0 : index
    %c0_4 = arith.constant 0 : index
    %3 = vector.load %arg3[%c0_3, %c0_4] : memref<1x32xf32, #tpu.memory_space<vmem>>, vector<1x32xf32>
    %4 = vector.broadcast %3 : vector<1x32xf32> to vector<34x32xf32>
    %5 = arith.addf %2, %4 : vector<34x32xf32>
    %c0_5 = arith.constant 0 : index
    %c0_6 = arith.constant 0 : index
    %6 = vector.load %arg4[%c0_5, %c0_6] : memref<34x32xf32, #tpu.memory_space<vmem>>, vector<34x32xf32>
    %7 = arith.addf %5, %6 : vector<34x32xf32>
    %c0_7 = arith.constant 0 : index
    %c0_8 = arith.constant 0 : index
    %8 = vector.load %arg5[%c0_7, %c0_8] : memref<34x32xf32, #tpu.memory_space<vmem>>, vector<34x32xf32>
    tpu.vector_store %arg5[%c0_7, %c0_8], %7 {strides = array<i32>} : memref<34x32xf32, #tpu.memory_space<vmem>>, vector<34x32xf32>,
    return
  }
  func.func @transform_0(%arg0: i32) -> (i32, i32) {
    %c0_i32 = arith.constant 0 : i32
    %c0_i32_0 = arith.constant 0 : i32
    return %arg0, %c0_i32 : i32, i32
  }
  func.func @transform_1(%arg0: i32) -> (i32, i32) {
    %c0_i32 = arith.constant 0 : i32
    %c0_i32_0 = arith.constant 0 : i32
    %c0_i32_1 = arith.constant 0 : i32
    return %c0_i32, %c0_i32_0 : i32, i32
  }
  func.func @transform_2(%arg0: i32) -> (i32, i32) {
    %c0_i32 = arith.constant 0 : i32
    %c0_i32_0 = arith.constant 0 : i32
    %c0_i32_1 = arith.constant 0 : i32
    return %c0_i32, %c0_i32_0 : i32, i32
  }
  func.func @transform_3(%arg0: i32) -> (i32, i32) {
    %c0_i32 = arith.constant 0 : i32
    %c0_i32_0 = arith.constant 0 : i32
    return %arg0, %c0_i32 : i32, i32
  }
  func.func @transform_4(%arg0: i32) -> (i32, i32) {
    %c0_i32 = arith.constant 0 : i32
    %c0_i32_0 = arith.constant 0 : i32
    return %arg0, %c0_i32 : i32, i32
  }
}

module attributes {stable_mosaic.version = 11 : i64} {
  func.func @_linear_kernel(%arg0: i32, %arg1: memref<34x32xf32, #tpu.memory_space<vmem>>, %arg2: memref<32x128xf32, #tpu.memory_space<vmem>>, %arg3: memref<1x128xf32, #tpu.memory_space<vmem>>, %arg4: memref<34x128xf32, #tpu.memory_space<vmem>>) attributes {dimension_semantics = [#tpu.dimension_semantics<parallel>], iteration_bounds = array<i64: 1>, scalar_prefetch = 0 : i64, scratch_operands = 0 : i64, tpu.core_type = #tpu.core_type<tc>, window_params = [{transform_indices = @transform_0, window_bounds = array<i64: 34, 32>}, {pipeline_mode = #tpu.pipeline_mode<synchronous>, transform_indices = @transform_1, window_bounds = array<i64: 32, 128>}, {pipeline_mode = #tpu.pipeline_mode<synchronous>, transform_indices = @transform_2, window_bounds = array<i64: 1, 128>}, {transform_indices = @transform_3, window_bounds = array<i64: 34, 128>}]} {
    %c0 = arith.constant 0 : index
    %c0_0 = arith.constant 0 : index
    %0 = vector.load %arg1[%c0, %c0_0] : memref<34x32xf32, #tpu.memory_space<vmem>>, vector<34x32xf32>
    %c0_1 = arith.constant 0 : index
    %c0_2 = arith.constant 0 : index
    %1 = vector.load %arg2[%c0_1, %c0_2] : memref<32x128xf32, #tpu.memory_space<vmem>>, vector<32x128xf32>
    %cst = arith.constant dense<0.000000e+00> : vector<34x128xf32>
    %2 = tpu.matmul %0, %1, %cst {dimension_numbers = #tpu.dot_dimension_numbers<[1], [0], [0], [1], [0, 0, 1, 1], [], []>} : vector<34x32xf32>, vector<32x128xf32>, vector<34x128xf32> -> vector<34x128xf32>
    %c0_3 = arith.constant 0 : index
    %c0_4 = arith.constant 0 : index
    %3 = vector.load %arg3[%c0_3, %c0_4] : memref<1x128xf32, #tpu.memory_space<vmem>>, vector<1x128xf32>
    %4 = vector.broadcast %3 : vector<1x128xf32> to vector<34x128xf32>
    %5 = arith.addf %2, %4 : vector<34x128xf32>
    %cst_5 = arith.constant 5.000000e-01 : f32
    %6 = vector.broadcast %cst_5 : f32 to vector<34x128xf32>
    %7 = arith.mulf %6, %5 : vector<34x128xf32>
    %cst_6 = arith.constant 4.471500e-02 : f32
    %8 = vector.broadcast %cst_6 : f32 to vector<34x128xf32>
    %9 = arith.mulf %8, %5 : vector<34x128xf32>
    %10 = arith.mulf %9, %5 : vector<34x128xf32>
    %11 = arith.mulf %10, %5 : vector<34x128xf32>
    %12 = arith.addf %5, %11 : vector<34x128xf32>
    %cst_7 = arith.constant 0.797884583 : f32
    %13 = vector.broadcast %cst_7 : f32 to vector<34x128xf32>
    %14 = arith.mulf %13, %12 : vector<34x128xf32>
    %15 = math.tanh %14 : vector<34x128xf32>
    %cst_8 = arith.constant 1.000000e+00 : f32
    %16 = vector.broadcast %cst_8 : f32 to vector<34x128xf32>
    %17 = arith.addf %16, %15 : vector<34x128xf32>
    %18 = arith.mulf %7, %17 : vector<34x128xf32>
    %c0_9 = arith.constant 0 : index
    %c0_10 = arith.constant 0 : index
    %19 = vector.load %arg4[%c0_9, %c0_10] : memref<34x128xf32, #tpu.memory_space<vmem>>, vector<34x128xf32>
    tpu.vector_store %arg4[%c0_9, %c0_10], %18 {strides = array<i32>} : memref<34x128xf32, #tpu.memory_space<vmem>>, vector<34x128xf32>,
    return
  }
  func.func @transform_0(%arg0: i32) -> (i32, i32) {
    %c0_i32 = arith.constant 0 : i32
    %c0_i32_0 = arith.constant 0 : i32
    return %arg0, %c0_i32 : i32, i32
  }
  func.func @transform_1(%arg0: i32) -> (i32, i32) {
    %c0_i32 = arith.constant 0 : i32
    %c0_i32_0 = arith.constant 0 : i32
    %c0_i32_1 = arith.constant 0 : i32
    return %c0_i32, %c0_i32_0 : i32, i32
  }
  func.func @transform_2(%arg0: i32) -> (i32, i32) {
    %c0_i32 = arith.constant 0 : i32
    %c0_i32_0 = arith.constant 0 : i32
    %c0_i32_1 = arith.constant 0 : i32
    return %c0_i32, %c0_i32_0 : i32, i32
  }
  func.func @transform_3(%arg0: i32) -> (i32, i32) {
    %c0_i32 = arith.constant 0 : i32
    %c0_i32_0 = arith.constant 0 : i32
    return %arg0, %c0_i32 : i32, i32
  }
}

module attributes {stable_mosaic.version = 11 : i64} {
  func.func @_linear_residual_kernel(%arg0: i32, %arg1: memref<34x128xf32, #tpu.memory_space<vmem>>, %arg2: memref<128x32xf32, #tpu.memory_space<vmem>>, %arg3: memref<1x32xf32, #tpu.memory_space<vmem>>, %arg4: memref<34x32xf32, #tpu.memory_space<vmem>>, %arg5: memref<34x32xf32, #tpu.memory_space<vmem>>) attributes {dimension_semantics = [#tpu.dimension_semantics<parallel>], iteration_bounds = array<i64: 1>, scalar_prefetch = 0 : i64, scratch_operands = 0 : i64, tpu.core_type = #tpu.core_type<tc>, window_params = [{transform_indices = @transform_0, window_bounds = array<i64: 34, 128>}, {pipeline_mode = #tpu.pipeline_mode<synchronous>, transform_indices = @transform_1, window_bounds = array<i64: 128, 32>}, {pipeline_mode = #tpu.pipeline_mode<synchronous>, transform_indices = @transform_2, window_bounds = array<i64: 1, 32>}, {transform_indices = @transform_3, window_bounds = array<i64: 34, 32>}, {transform_indices = @transform_4, window_bounds = array<i64: 34, 32>}]} {
    %c0 = arith.constant 0 : index
    %c0_0 = arith.constant 0 : index
    %0 = vector.load %arg1[%c0, %c0_0] : memref<34x128xf32, #tpu.memory_space<vmem>>, vector<34x128xf32>
    %c0_1 = arith.constant 0 : index
    %c0_2 = arith.constant 0 : index
    %1 = vector.load %arg2[%c0_1, %c0_2] : memref<128x32xf32, #tpu.memory_space<vmem>>, vector<128x32xf32>
    %cst = arith.constant dense<0.000000e+00> : vector<34x32xf32>
    %2 = tpu.matmul %0, %1, %cst {dimension_numbers = #tpu.dot_dimension_numbers<[1], [0], [0], [1], [0, 0, 1, 1], [], []>} : vector<34x128xf32>, vector<128x32xf32>, vector<34x32xf32> -> vector<34x32xf32>
    %c0_3 = arith.constant 0 : index
    %c0_4 = arith.constant 0 : index
    %3 = vector.load %arg3[%c0_3, %c0_4] : memref<1x32xf32, #tpu.memory_space<vmem>>, vector<1x32xf32>
    %4 = vector.broadcast %3 : vector<1x32xf32> to vector<34x32xf32>
    %5 = arith.addf %2, %4 : vector<34x32xf32>
    %c0_5 = arith.constant 0 : index
    %c0_6 = arith.constant 0 : index
    %6 = vector.load %arg4[%c0_5, %c0_6] : memref<34x32xf32, #tpu.memory_space<vmem>>, vector<34x32xf32>
    %7 = arith.addf %5, %6 : vector<34x32xf32>
    %c0_7 = arith.constant 0 : index
    %c0_8 = arith.constant 0 : index
    %8 = vector.load %arg5[%c0_7, %c0_8] : memref<34x32xf32, #tpu.memory_space<vmem>>, vector<34x32xf32>
    tpu.vector_store %arg5[%c0_7, %c0_8], %7 {strides = array<i32>} : memref<34x32xf32, #tpu.memory_space<vmem>>, vector<34x32xf32>,
    return
  }
  func.func @transform_0(%arg0: i32) -> (i32, i32) {
    %c0_i32 = arith.constant 0 : i32
    %c0_i32_0 = arith.constant 0 : i32
    return %arg0, %c0_i32 : i32, i32
  }
  func.func @transform_1(%arg0: i32) -> (i32, i32) {
    %c0_i32 = arith.constant 0 : i32
    %c0_i32_0 = arith.constant 0 : i32
    %c0_i32_1 = arith.constant 0 : i32
    return %c0_i32, %c0_i32_0 : i32, i32
  }
  func.func @transform_2(%arg0: i32) -> (i32, i32) {
    %c0_i32 = arith.constant 0 : i32
    %c0_i32_0 = arith.constant 0 : i32
    %c0_i32_1 = arith.constant 0 : i32
    return %c0_i32, %c0_i32_0 : i32, i32
  }
  func.func @transform_3(%arg0: i32) -> (i32, i32) {
    %c0_i32 = arith.constant 0 : i32
    %c0_i32_0 = arith.constant 0 : i32
    return %arg0, %c0_i32 : i32, i32
  }
  func.func @transform_4(%arg0: i32) -> (i32, i32) {
    %c0_i32 = arith.constant 0 : i32
    %c0_i32_0 = arith.constant 0 : i32
    return %arg0, %c0_i32 : i32, i32
  }
}

module attributes {stable_mosaic.version = 11 : i64} {
  func.func @_linear_kernel(%arg0: i32, %arg1: memref<2x32xf32, #tpu.memory_space<vmem>>, %arg2: memref<32x10xf32, #tpu.memory_space<vmem>>, %arg3: memref<1x10xf32, #tpu.memory_space<vmem>>, %arg4: memref<2x10xf32, #tpu.memory_space<vmem>>) attributes {dimension_semantics = [#tpu.dimension_semantics<parallel>], iteration_bounds = array<i64: 1>, scalar_prefetch = 0 : i64, scratch_operands = 0 : i64, tpu.core_type = #tpu.core_type<tc>, window_params = [{transform_indices = @transform_0, window_bounds = array<i64: 2, 32>}, {pipeline_mode = #tpu.pipeline_mode<synchronous>, transform_indices = @transform_1, window_bounds = array<i64: 32, 10>}, {pipeline_mode = #tpu.pipeline_mode<synchronous>, transform_indices = @transform_2, window_bounds = array<i64: 1, 10>}, {transform_indices = @transform_3, window_bounds = array<i64: 2, 10>}]} {
    %c0 = arith.constant 0 : index
    %c0_0 = arith.constant 0 : index
    %0 = vector.load %arg1[%c0, %c0_0] : memref<2x32xf32, #tpu.memory_space<vmem>>, vector<2x32xf32>
    %c0_1 = arith.constant 0 : index
    %c0_2 = arith.constant 0 : index
    %1 = vector.load %arg2[%c0_1, %c0_2] : memref<32x10xf32, #tpu.memory_space<vmem>>, vector<32x10xf32>
    %cst = arith.constant dense<0.000000e+00> : vector<2x10xf32>
    %2 = tpu.matmul %0, %1, %cst {dimension_numbers = #tpu.dot_dimension_numbers<[1], [0], [0], [1], [0, 0, 1, 1], [], []>} : vector<2x32xf32>, vector<32x10xf32>, vector<2x10xf32> -> vector<2x10xf32>
    %c0_3 = arith.constant 0 : index
    %c0_4 = arith.constant 0 : index
    %3 = vector.load %arg3[%c0_3, %c0_4] : memref<1x10xf32, #tpu.memory_space<vmem>>, vector<1x10xf32>
    %4 = vector.broadcast %3 : vector<1x10xf32> to vector<2x10xf32>
    %5 = arith.addf %2, %4 : vector<2x10xf32>
    %c0_5 = arith.constant 0 : index
    %c0_6 = arith.constant 0 : index
    %6 = vector.load %arg4[%c0_5, %c0_6] : memref<2x10xf32, #tpu.memory_space<vmem>>, vector<2x10xf32>
    tpu.vector_store %arg4[%c0_5, %c0_6], %5 {strides = array<i32>} : memref<2x10xf32, #tpu.memory_space<vmem>>, vector<2x10xf32>,
    return
  }
  func.func @transform_0(%arg0: i32) -> (i32, i32) {
    %c0_i32 = arith.constant 0 : i32
    %c0_i32_0 = arith.constant 0 : i32
    return %arg0, %c0_i32 : i32, i32
  }
  func.func @transform_1(%arg0: i32) -> (i32, i32) {
    %c0_i32 = arith.constant 0 : i32
    %c0_i32_0 = arith.constant 0 : i32
    %c0_i32_1 = arith.constant 0 : i32
    return %c0_i32, %c0_i32_0 : i32, i32
  }
  func.func @transform_2(%arg0: i32) -> (i32, i32) {
    %c0_i32 = arith.constant 0 : i32
    %c0_i32_0 = arith.constant 0 : i32
    %c0_i32_1 = arith.constant 0 : i32
    return %c0_i32, %c0_i32_0 : i32, i32
  }
  func.func @transform_3(%arg0: i32) -> (i32, i32) {
    %c0_i32 = arith.constant 0 : i32
    %c0_i32_0 = arith.constant 0 : i32
    return %arg0, %c0_i32 : i32, i32
  }
}

</mosaic_0001>

<bundles_post_ra>
// kernel: vit_forward.17
= control target key start
LH: loop header
LB: loop body
LE: loop exit
PB: predicated region body
PF: predicated region fallthrough
CT: control target
= control target key end

     0   :  { %vm33_vm0 = vcmask 523264   ;;  %vm131_vm1 = vcmask 261120   ;;  %s278_s1 = inlined_call_operand.vmem [shape: f32[64,32], index: 1, kind: input, shape index: {}]   ;;  %s279_s0 = inlined_call_operand.vmem [shape: f32[32,64], index: 0, kind: input, shape index: {}]   ;;  %s280_s2 = inlined_call_operand.vmem [shape: f32[1,32], index: 2, kind: input, shape index: {}]   ;;  %s281_s3 = inlined_call_operand.vmem [shape: f32[32,32], index: 3, kind: output, shape index: {}]  }
   0x1   :  { %v18_v0 = vld [vmem:[%s278_s1] sm:$0xff]  ;;  %v19_v1 = vld [vmem:[%s278_s1 + $0x8] sm:$0xff]  ;;  %v20_v2 = vld [vmem:[%s278_s1 + $0x10] sm:$0xff] }
   0x2   :  { %v179_v3 = vpack.c.bf16 %v19_v1, %v18_v0  ;;  %v21_v4 = vld [vmem:[%s278_s1 + $0x18] sm:$0xff]  ;;  %v22_v6 = vld [vmem:[%s278_s1 + $0x20] sm:$0xff]  ;;  %v23_v7 = vld [vmem:[%s278_s1 + $0x28] sm:$0xff] }
   0x3   :  { %v183_v5 = vpack.c.bf16 %v21_v4, %v20_v2  ;;  %v14_v8 = vld [vmem:[%s279_s0] sm:$0xff]  ;;  %v16_v9 = vld [vmem:[%s279_s0 + $0x10] sm:$0xff]  ;;  %v187_v10 = vpack.c.bf16 %v23_v7, %v22_v6  ;;  %v25_v12 = vld [vmem:[%s278_s1 + $0x38] sm:$0xff] }
   0x4   :  { %180 = vmatprep.subr.bf16.mxu0 %v179_v3  ;;  %195 = vmatprep.subr.bf16.mxu1 %v179_v3  ;;  %v24_v11 = vld [vmem:[%s278_s1 + $0x30] sm:$0xff]  ;;  %v15_v14 = vld [vmem:[%s279_s0 + $0x8] sm:$0xff]  ;;  %v17_v15 = vld [vmem:[%s279_s0 + $0x18] sm:$0xff] }
   0x5   :  { %182 = vmatpush3.bf16.msra.mxu0 %v179_v3  ;;  %199 = vmatpush3.bf16.msra.mxu1 %v179_v3  ;;  %v191_v13 = vpack.c.bf16 %v25_v12, %v24_v11  ;;  %v140_v16 = vld [vmem:[%s280_s2] ss:$0 sm:$0xff] }
   0x6   :  { %184 = vmatprep.subr.bf16.mxu0 %v183_v5  ;;  %196 = vmatprep.subr.bf16.mxu1 %v183_v5 }
   0x7   :  { %173 = vmatprep.mubr.msk.f32.mxu0 %vm33_vm0, %v14_v8  ;;  %176 = vmatprep.mubr.msk.f32.mxu1 %vm33_vm0, %v16_v9 }
   0x9   :  { %186 = vmatpush3.bf16.msra.mxu0 %v183_v5  ;;  %200 = vmatpush3.bf16.msra.mxu1 %v183_v5 }
   0xa   :  { %188 = vmatprep.subr.bf16.mxu0 %v187_v10  ;;  %197 = vmatprep.subr.bf16.mxu1 %v187_v10 }
   0xd   :  { %190 = vmatpush3.bf16.msra.mxu0 %v187_v10  ;;  %201 = vmatpush3.bf16.msra.mxu1 %v187_v10 }
   0xe   :  { %192 = vmatprep.subr.bf16.mxu0 %v191_v13  ;;  %198 = vmatprep.subr.bf16.mxu1 %v191_v13 }
  0x11   :  { %194 = vmatpush3.bf16.msra.mxu0 %v191_v13  ;;  %202 = vmatpush3.bf16.msra.mxu1 %v191_v13 }
  0x14   :  { %174 = vmatmul.mubr.msk.f32.vlgmr.msra.gmra.mrb[0].mxu0 %vm33_vm0, %v15_v14  ;;  %177 = vmatmul.mubr.msk.f32.vlgmr.msra.gmra.mrb[0].mxu1 %vm33_vm0, %v17_v15 }
  0xe7   :  { %v175_v17 = vpop.f32.mrb[0].mxu0  ;;  %v178_v18 = vpop.f32.mrb[0].mxu1 }
  0xe8   :  { %v118_v19 = vadd.f32 %v175_v17, %v140_v16  ;;  %v128_v20 = vadd.f32 %v178_v18, %v140_v16  ;;  %v112_v21 = vpop.f32.mrb[1].mxu0  ;;  %v122_v22 = vpop.f32.mrb[1].mxu1 }
  0xe9   :  { %v113_v23 = vadd.f32 %v140_v16, %v112_v21  ;;  %v123_v24 = vadd.f32 %v140_v16, %v122_v22 }
  0xea   :  { %133 = vst.msk [vmem:[%s281_s3 + $0x8] sm:$0xff] %vm131_vm1, %v118_v19  ;;  %135 = vst.msk [vmem:[%s281_s3 + $0x18] sm:$0xff] %vm131_vm1, %v128_v20 }
  0xeb   :  { %132 = vst.msk [vmem:[%s281_s3] sm:$0xff] %vm131_vm1, %v113_v23  ;;  %134 = vst.msk [vmem:[%s281_s3 + $0x10] sm:$0xff] %vm131_vm1, %v123_v24 }

// kernel: vit_forward.18
= control target key start
LH: loop header
LB: loop body
LE: loop exit
PB: predicated region body
PF: predicated region fallthrough
CT: control target
= control target key end

     0   :  { %vm19_vm0 = vcmask 261120   ;;  %vm32_vm1 = vcmask 254976   ;;  %s203_s0 = inlined_call_operand.vmem [shape: f32[34,32], index: 0, kind: input, shape index: {}]   ;;  %s204_s1 = inlined_call_operand.vmem [shape: f32[1,32], index: 1, kind: input, shape index: {}]   ;;  %s205_s2 = inlined_call_operand.vmem [shape: f32[1,32], index: 2, kind: input, shape index: {}]   ;;  %s206_s3 = inlined_call_operand.vmem [shape: f32[34,32], index: 3, kind: output, shape index: {}]  }
   0x1   :  { %v14_v0 = vld [vmem:[%s203_s0] sm:$0xff]  ;;  %v16_v1 = vld [vmem:[%s203_s0 + $0x10] sm:$0xff]  ;;  %v15_v2 = vld [vmem:[%s203_s0 + $0x8] sm:$0xff] }
   0x2   :  { %v20_v3 = vsel %vm19_vm0, %v14_v0, 0.0  ;;  %v26_v4 = vsel %vm19_vm0, %v16_v1, 0.0  ;;  %v17_v5 = vld [vmem:[%s203_s0 + $0x18] sm:$0xff]  ;;  %v23_v6 = vsel %vm19_vm0, %v15_v2, 0.0  ;;  %v18_v8 = vld [vmem:[%s203_s0 + $0x20] sm:$0x3] }
   0x3   :  { %21 = vadd.xlane.f32.xlu0 %v20_v3  ;;  %27 = vadd.xlane.f32.xlu1 %v26_v4  ;;  %v29_v7 = vsel %vm19_vm0, %v17_v5, 0.0  ;;  %v33_v9 = vsel %vm32_vm1, %v18_v8, 0.0  ;;  %v120_v51 = vld [vmem:[%s204_s1] ss:$0 sm:$0xff] }
   0x4   :  { %v121_v53 = vld [vmem:[%s205_s2] ss:$0 sm:$0xff] }
   0x7   :  { %24 = vadd.xlane.f32.xlu0 %v23_v6  ;;  %30 = vadd.xlane.f32.xlu1 %v29_v7 }
   0xb   :  { %34 = vadd.xlane.f32.xlu0 %v33_v9 }
  0x90   :  { %v22_v10 = vpop.xlane.xlu0 %21  ;;  %v28_v11 = vpop.xlane.xlu1 %27 }
  0x91   :  { %v37_v12 = vmul.f32 0.03125, %v22_v10  ;;  %v39_v13 = vmul.f32 0.03125, %v28_v11 }
  0x93   :  { %v42_v14 = vsub.f32 %v14_v0, %v37_v12  ;;  %v44_v15 = vsub.f32 %v16_v1, %v39_v13 }
  0x94   :  { %v25_v16 = vpop.xlane.xlu0 %24  ;;  %v31_v17 = vpop.xlane.xlu1 %30 }
  0x95   :  { %v38_v18 = vmul.f32 0.03125, %v25_v16  ;;  %v40_v19 = vmul.f32 0.03125, %v31_v17  ;;  %v47_v20 = vmul.f32 %v42_v14, %v42_v14  ;;  %v49_v21 = vmul.f32 %v44_v15, %v44_v15 }
  0x97   :  { %v43_v22 = vsub.f32 %v15_v2, %v38_v18  ;;  %v45_v23 = vsub.f32 %v17_v5, %v40_v19  ;;  %v52_v24 = vsel %vm19_vm0, %v47_v20, 0.0  ;;  %v58_v27 = vsel %vm19_vm0, %v49_v21, 0.0 }
  0x98   :  { %53 = vadd.xlane.f32.xlu1 %v52_v24  ;;  %v35_v25 = vpop.xlane.xlu0 %34 }
  0x99   :  { %v41_v26 = vmul.f32 0.03125, %v35_v25  ;;  %v48_v28 = vmul.f32 %v43_v22, %v43_v22  ;;  %v50_v29 = vmul.f32 %v45_v23, %v45_v23 }
  0x9b   :  { %v46_v30 = vsub.f32 %v18_v8, %v41_v26  ;;  %v55_v31 = vsel %vm19_vm0, %v48_v28, 0.0  ;;  %v61_v32 = vsel %vm19_vm0, %v50_v29, 0.0 }
  0x9c   :  { %59 = vadd.xlane.f32.xlu1 %v58_v27  ;;  %56 = vadd.xlane.f32.xlu0 %v55_v31 }
  0x9d   :  { %v51_v33 = vmul.f32 %v46_v30, %v46_v30 }
  0x9f   :  { %v64_v34 = vsel %vm32_vm1, %v51_v33, 0.0 }
  0xa0   :  { %62 = vadd.xlane.f32.xlu0 %v61_v32  ;;  %65 = vadd.xlane.f32.xlu1 %v64_v34 }
 0x125   :  { %v54_v35 = vpop.xlane.xlu1 %53 }
 0x126   :  { %v67_v36 = vmul.f32 0.03125, %v54_v35 }
 0x128   :  { %v72_v37 = vadd.f32 1e-06, %v67_v36 }
 0x129   :  { %v60_v38 = vpop.xlane.xlu1 %59  ;;  %v57_v39 = vpop.xlane.xlu0 %56 }
 0x12a   :  { %122 = vrsqrt.f32 %v72_v37  ;;  %v69_v40 = vmul.f32 0.03125, %v60_v38  ;;  %v68_v41 = vmul.f32 0.03125, %v57_v39 }
 0x12c   :  { %v74_v42 = vadd.f32 1e-06, %v69_v40  ;;  %v73_v43 = vadd.f32 1e-06, %v68_v41 }
 0x12d   :  { %v66_v44 = vpop.xlane.xlu1 %65  ;;  %v63_v45 = vpop.xlane.xlu0 %62 }
 0x12e   :  { %124 = vrsqrt.f32 %v74_v42  ;;  %v71_v46 = vmul.f32 0.03125, %v66_v44  ;;  %v70_v47 = vmul.f32 0.03125, %v63_v45 }
 0x12f   :  { %126 = vrsqrt.f32 %v73_v43 }
 0x130   :  { %v76_v48 = vadd.f32 1e-06, %v71_v46  ;;  %v75_v49 = vadd.f32 1e-06, %v70_v47 }
 0x132   :  { %128 = vrsqrt.f32 %v76_v48 }
 0x133   :  { %130 = vrsqrt.f32 %v75_v49 }
 0x134   :  { %v123_v50 = vpop.eup %122 }
 0x135   :  { %v82_v52 = vmul.f32 %v123_v50, %v42_v14 }
 0x137   :  { %v94_v54 = vmul.f32 %v120_v51, %v82_v52 }
 0x138   :  { %v125_v55 = vpop.eup %124 }
 0x139   :  { %v127_v56 = vpop.eup %126  ;;  %v106_v57 = vadd.f32 %v121_v53, %v94_v54  ;;  %v84_v58 = vmul.f32 %v125_v55, %v44_v15 }
 0x13a   :  { %v83_v59 = vmul.f32 %v127_v56, %v43_v22 }
 0x13b   :  { %111 = vst.msk [vmem:[%s206_s3] sm:$0xff] %vm19_vm0, %v106_v57  ;;  %v96_v60 = vmul.f32 %v120_v51, %v84_v58 }
 0x13c   :  { %v129_v61 = vpop.eup %128  ;;  %v95_v62 = vmul.f32 %v120_v51, %v83_v59 }
 0x13d   :  { %v131_v63 = vpop.eup %130  ;;  %v108_v0 = vadd.f32 %v121_v53, %v96_v60  ;;  %v86_v1 = vmul.f32 %v129_v61, %v46_v30 }
 0x13e   :  { %v107_v2 = vadd.f32 %v121_v53, %v95_v62  ;;  %v85_v3 = vmul.f32 %v131_v63, %v45_v23 }
 0x13f   :  { %113 = vst.msk [vmem:[%s206_s3 + $0x10] sm:$0xff] %vm19_vm0, %v108_v0  ;;  %v98_v4 = vmul.f32 %v120_v51, %v86_v1 }
 0x140   :  { %112 = vst.msk [vmem:[%s206_s3 + $0x8] sm:$0xff] %vm19_vm0, %v107_v2  ;;  %v97_v5 = vmul.f32 %v120_v51, %v85_v3 }
 0x141   :  { %v110_v6 = vadd.f32 %v121_v53, %v98_v4 }
 0x142   :  { %v109_v7 = vadd.f32 %v121_v53, %v97_v5 }
 0x143   :  { %115 = vst.msk [vmem:[%s206_s3 + $0x20] sm:$0x3] %vm32_vm1, %v110_v6 }
 0x144   :  { %114 = vst.msk [vmem:[%s206_s3 + $0x18] sm:$0xff] %vm19_vm0, %v109_v7 }

// kernel: vit_forward.19
= control target key start
LH: loop header
LB: loop body
LE: loop exit
PB: predicated region body
PF: predicated region fallthrough
CT: control target
= control target key end

     0   :  { %v198_v0 = vmov 0.0|0.0   ;;  %vm199_vm0 = vmmov 0   ;;  %v200_v6 = vmov 0.0   ;;  %vm30_vm1 = vcmask 261120   ;;  %s275_s1 = inlined_call_operand.vmem [shape: f32[32,96], index: 1, kind: input, shape index: {}]   ;;  %s276_s0 = inlined_call_operand.vmem [shape: f32[34,32], index: 0, kind: input, shape index: {}]   ;;  %s277_s2 = inlined_call_operand.vmem [shape: f32[1,96], index: 2, kind: input, shape index: {}]   ;;  %s278_s3 = inlined_call_operand.vmem [shape: f32[34,96], index: 3, kind: output, shape index: {}]  }
   0x1   :  { %185 = vmatprep.subr.bf16.mxu0 %v198_v0  ;;  %v19_v1 = vld [vmem:[%s275_s1] sm:$0xff]  ;;  %v20_v2 = vld [vmem:[%s275_s1 + $0x8] sm:$0xff]  ;;  %191 = vmatprep.subr.bf16.mxu1 %v198_v0  ;;  %v21_v3 = vld [vmem:[%s275_s1 + $0x10] sm:$0xff]  ;;  %vm136_vm2 = vcmask 785408   ;;  %vm141_vm3 = vcmask 779264  }
   0x2   :  { %v186_v4 = vpack.c.bf16 %v20_v2, %v19_v1  ;;  %v22_v5 = vld [vmem:[%s275_s1 + $0x18] sm:$0xff]  ;;  %170 = vmatprep.mubr.msk.f32.mxu0 %vm199_vm0, %v200_v6  ;;  %179 = vmatprep.mubr.msk.f32.mxu1 %vm199_vm0, %v200_v6  ;;  %v14_v8 = vld [vmem:[%s276_s0] sm:$0xff]  ;;  %v15_v10 = vld [vmem:[%s276_s0 + $0x8] sm:$0xff] }
   0x3   :  { %v189_v7 = vpack.c.bf16 %v22_v5, %v21_v3  ;;  %v17_v9 = vld [vmem:[%s276_s0 + $0x18] sm:$0xff]  ;;  %v18_v11 = vld [vmem:[%s276_s0 + $0x20] sm:$0x3]  ;;  %v16_v12 = vld [vmem:[%s276_s0 + $0x10] sm:$0xff] }
   0x4   :  { %187 = vmatpush3.bf16.msra.mxu0 %v186_v4  ;;  %193 = vmatpush3.bf16.msra.mxu1 %v186_v4  ;;  %v147_v13 = vld [vmem:[%s277_s2] ss:$0 sm:$0xff] }
   0x5   :  { %188 = vmatprep.subr.bf16.mxu0 %v198_v0  ;;  %192 = vmatprep.subr.bf16.mxu1 %v198_v0 }
   0x8   :  { %190 = vmatpush3.bf16.msra.mxu0 %v189_v7  ;;  %194 = vmatpush3.bf16.msra.mxu1 %v189_v7 }
   0xb   :  { %171 = vmatmul.mubr.msk.f32.vlgmr.msra.gmra.mrb[0].mxu0 %vm30_vm1, %v14_v8  ;;  %180 = vmatmul.mubr.msk.f32.vlgmr.msra.gmra.mrb[0].mxu1 %vm30_vm1, %v17_v9 }
   0xc   :  { %173 = vmatprep.mubr.msk.f32.mxu0 %vm199_vm0, %v200_v6  ;;  %182 = vmatprep.mubr.msk.f32.mxu1 %vm199_vm0, %v200_v6 }
   0xf   :  { %174 = vmatmul.mubr.msk.f32.gmra.mrb[2].mxu0 %vm30_vm1, %v15_v10  ;;  %183 = vmatmul.mubr.msk.f32.gmra.mrb[2].mxu1 %vm30_vm1, %v18_v11 }
  0x10   :  { %176 = vmatprep.mubr.msk.f32.mxu0 %vm199_vm0, %v200_v6 }
  0x13   :  { %177 = vmatmul.mubr.msk.f32.gmra.mrb[4].mxu0 %vm30_vm1, %v16_v12 }
  0xde   :  { %v112_v14 = vpop.f32.mrb[0].mxu0  ;;  %v127_v15 = vpop.f32.mrb[0].mxu1 }
  0xdf   :  { %v113_v16 = vadd.f32 %v147_v13, %v112_v14  ;;  %v172_v17 = vpop.f32.mrb[1].mxu0  ;;  %v128_v18 = vadd.f32 %v147_v13, %v127_v15  ;;  %v181_v19 = vpop.f32.mrb[1].mxu1 }
  0xe1   :  { %137 = vst.msk [vmem:[%s278_s3] sm:$0xff] %vm136_vm2, %v113_v16  ;;  %140 = vst.msk [vmem:[%s278_s3 + $0x18] sm:$0xff] %vm136_vm2, %v128_v18 }
  0xe2   :  { %v117_v20 = vpop.f32.mrb[2].mxu0  ;;  %v132_v21 = vpop.f32.mrb[2].mxu1 }
  0xe3   :  { %v118_v22 = vadd.f32 %v147_v13, %v117_v20  ;;  %v175_v23 = vpop.f32.mrb[3].mxu0  ;;  %v133_v24 = vadd.f32 %v147_v13, %v132_v21  ;;  %v184_v25 = vpop.f32.mrb[3].mxu1 }
  0xe5   :  { %138 = vst.msk [vmem:[%s278_s3 + $0x8] sm:$0xff] %vm136_vm2, %v118_v22 }
  0xe6   :  { %142 = vst.msk [vmem:[%s278_s3 + $0x20] sm:$0x3] %vm141_vm3, %v133_v24  ;;  %v122_v26 = vpop.f32.mrb[4].mxu0 }
  0xe7   :  { %v123_v27 = vadd.f32 %v147_v13, %v122_v26  ;;  %v178_v28 = vpop.f32.mrb[5].mxu0 }
  0xe9   :  { %139 = vst.msk [vmem:[%s278_s3 + $0x10] sm:$0xff] %vm136_vm2, %v123_v27 }

// kernel: vit_forward.21
= control target key start
LH: loop header
LB: loop body
LE: loop exit
PB: predicated region body
PF: predicated region fallthrough
CT: control target
= control target key end

     0   :  { %v210_v0 = vmov 0.0|0.0   ;;  %vm211_vm0 = vmmov 0   ;;  %v212_v6 = vmov 0.0   ;;  %vm33_vm1 = vcmask 261120   ;;  %s312_s1 = inlined_call_operand.vmem [shape: f32[32,32], index: 1, kind: input, shape index: {}]   ;;  %s313_s0 = inlined_call_operand.vmem [shape: f32[34,32], index: 0, kind: input, shape index: {}]   ;;  %s314_s2 = inlined_call_operand.vmem [shape: f32[1,32], index: 2, kind: input, shape index: {}]   ;;  %s315_s3 = inlined_call_operand.vmem [shape: f32[34,32], index: 3, kind: input, shape index: {}]   ;;  %s316_s4 = inlined_call_operand.vmem [shape: f32[34,32], index: 4, kind: output, shape index: {}]  }
   0x1   :  { %197 = vmatprep.subr.bf16.mxu0 %v210_v0  ;;  %v22_v1 = vld [vmem:[%s312_s1] sm:$0xff]  ;;  %v23_v2 = vld [vmem:[%s312_s1 + $0x8] sm:$0xff]  ;;  %203 = vmatprep.subr.bf16.mxu1 %v210_v0  ;;  %v24_v3 = vld [vmem:[%s312_s1 + $0x10] sm:$0xff]  ;;  %vm153_vm2 = vcmask 254976  }
   0x2   :  { %v198_v4 = vpack.c.bf16 %v23_v2, %v22_v1  ;;  %v25_v5 = vld [vmem:[%s312_s1 + $0x18] sm:$0xff]  ;;  %182 = vmatprep.mubr.msk.f32.mxu0 %vm211_vm0, %v212_v6  ;;  %191 = vmatprep.mubr.msk.f32.mxu1 %vm211_vm0, %v212_v6  ;;  %v17_v8 = vld [vmem:[%s313_s0] sm:$0xff]  ;;  %v18_v10 = vld [vmem:[%s313_s0 + $0x8] sm:$0xff] }
   0x3   :  { %v201_v7 = vpack.c.bf16 %v25_v5, %v24_v3  ;;  %v20_v9 = vld [vmem:[%s313_s0 + $0x18] sm:$0xff]  ;;  %v21_v11 = vld [vmem:[%s313_s0 + $0x20] sm:$0x3]  ;;  %v19_v12 = vld [vmem:[%s313_s0 + $0x10] sm:$0xff] }
   0x4   :  { %199 = vmatpush3.bf16.msra.mxu0 %v198_v4  ;;  %205 = vmatpush3.bf16.msra.mxu1 %v198_v4  ;;  %v159_v13 = vld [vmem:[%s314_s2] ss:$0 sm:$0xff]  ;;  %v142_v17 = vld [vmem:[%s315_s3 + $0x18] sm:$0xff]  ;;  %v140_v25 = vld [vmem:[%s315_s3 + $0x8] sm:$0xff] }
   0x5   :  { %200 = vmatprep.subr.bf16.mxu0 %v210_v0  ;;  %204 = vmatprep.subr.bf16.mxu1 %v210_v0  ;;  %v139_v15 = vld [vmem:[%s315_s3] sm:$0xff]  ;;  %v141_v35 = vld [vmem:[%s315_s3 + $0x10] sm:$0xff] }
   0x6   :  { %v143_v27 = vld [vmem:[%s315_s3 + $0x20] sm:$0x3] }
   0x8   :  { %202 = vmatpush3.bf16.msra.mxu0 %v201_v7  ;;  %206 = vmatpush3.bf16.msra.mxu1 %v201_v7 }
   0xb   :  { %183 = vmatmul.mubr.msk.f32.vlgmr.msra.gmra.mrb[0].mxu0 %vm33_vm1, %v17_v8  ;;  %192 = vmatmul.mubr.msk.f32.vlgmr.msra.gmra.mrb[0].mxu1 %vm33_vm1, %v20_v9 }
   0xc   :  { %185 = vmatprep.mubr.msk.f32.mxu0 %vm211_vm0, %v212_v6  ;;  %194 = vmatprep.mubr.msk.f32.mxu1 %vm211_vm0, %v212_v6 }
   0xf   :  { %186 = vmatmul.mubr.msk.f32.gmra.mrb[2].mxu0 %vm33_vm1, %v18_v10  ;;  %195 = vmatmul.mubr.msk.f32.gmra.mrb[2].mxu1 %vm33_vm1, %v21_v11 }
  0x10   :  { %188 = vmatprep.mubr.msk.f32.mxu0 %vm211_vm0, %v212_v6 }
  0x13   :  { %189 = vmatmul.mubr.msk.f32.gmra.mrb[4].mxu0 %vm33_vm1, %v19_v12 }
  0xde   :  { %v115_v14 = vpop.f32.mrb[0].mxu0  ;;  %v130_v16 = vpop.f32.mrb[0].mxu1 }
  0xdf   :  { %v116_v18 = vadd.f32 %v159_v13, %v115_v14  ;;  %v184_v19 = vpop.f32.mrb[1].mxu0  ;;  %v131_v20 = vadd.f32 %v159_v13, %v130_v16  ;;  %v193_v21 = vpop.f32.mrb[1].mxu1 }
  0xe1   :  { %v144_v22 = vadd.f32 %v139_v15, %v116_v18  ;;  %v147_v23 = vadd.f32 %v142_v17, %v131_v20 }
  0xe2   :  { %v120_v24 = vpop.f32.mrb[2].mxu0  ;;  %v135_v26 = vpop.f32.mrb[2].mxu1 }
  0xe3   :  { %149 = vst.msk [vmem:[%s316_s4] sm:$0xff] %vm33_vm1, %v144_v22  ;;  %152 = vst.msk [vmem:[%s316_s4 + $0x18] sm:$0xff] %vm33_vm1, %v147_v23  ;;  %v121_v28 = vadd.f32 %v159_v13, %v120_v24  ;;  %v187_v29 = vpop.f32.mrb[3].mxu0  ;;  %v136_v30 = vadd.f32 %v159_v13, %v135_v26  ;;  %v196_v31 = vpop.f32.mrb[3].mxu1 }
  0xe5   :  { %v145_v32 = vadd.f32 %v140_v25, %v121_v28  ;;  %v148_v33 = vadd.f32 %v143_v27, %v136_v30 }
  0xe6   :  { %v125_v34 = vpop.f32.mrb[4].mxu0 }
  0xe7   :  { %150 = vst.msk [vmem:[%s316_s4 + $0x8] sm:$0xff] %vm33_vm1, %v145_v32  ;;  %v126_v36 = vadd.f32 %v159_v13, %v125_v34  ;;  %v190_v37 = vpop.f32.mrb[5].mxu0 }
  0xe8   :  { %154 = vst.msk [vmem:[%s316_s4 + $0x20] sm:$0x3] %vm153_vm2, %v148_v33 }
  0xe9   :  { %v146_v38 = vadd.f32 %v141_v35, %v126_v36 }
  0xeb   :  { %151 = vst.msk [vmem:[%s316_s4 + $0x10] sm:$0xff] %vm33_vm1, %v146_v38 }

// kernel: vit_forward.20
= control target key start
LH: loop header
LB: loop body
LE: loop exit
PB: predicated region body
PF: predicated region fallthrough
CT: control target
= control target key end

     0   :  { %s658_s12 = smov 0   ;;  %s718_s0 = inlined_call_operand.vmem [shape: f32[8,17,8], index: 0, kind: input, shape index: {}]   ;;  %s719_s1 = inlined_call_operand.vmem [shape: f32[8,17,8], index: 1, kind: input, shape index: {}]   ;;  %s720_s2 = inlined_call_operand.vmem [shape: f32[8,17,8], index: 2, kind: input, shape index: {}]   ;;  %s721_s3 = inlined_call_operand.vmem [shape: f32[8,17,8], index: 3, kind: output, shape index: {}]  }
   0x1 LB: > { %s533_s13 = sadd.s32 4294967295, %s633_s12   ;;  %p537_p0 = scmp.ge.s32.totalorder %s633_s12, 1  ;;  %s633_s12 = sphi %s658_s12, %s13_s12  }
   0x2   : > { %p157_p1 = scmp.lt.s32.totalorder %s633_s12, 9 }
   0x4   : > { %p158_p2 = pnand %p537_p0, %p157_p1 }
   0x5   : > { %p191_p3 = scmp.lt.s32.totalorder (!%p158_p2), %s533_s13, 7  ;;  %v635_v0 = vmov (!%p158_p2), 0.0|0.0   ;;  %vm636_vm0 = vmmov (!%p158_p2), 0   ;;  %v637_v1 = vmov (!%p158_p2), 0.0   ;;  %vm220_vm1 = vcmask (!%p158_p2), 64512  }
   0x6   : > { %161 = sbr.rel (%p158_p2) target bundleno = 780 (0x30c), region = 32  ;;  %596 = vmatprep.subr.bf16.mxu0 (!%p158_p2), %v635_v0  ;;  %572 = vmatprep.mubr.msk.f32.mxu0 (!%p158_p2), %vm636_vm0, %v637_v1  ;;  %vm598_vm2 = vmpackc.low (!%p158_p2), %vm220_vm1, %vm220_vm1  ;;  %vm322_vm3 = vcmask (!%p158_p2), 138240   ;;  %vm329_vm4 = vcmask (!%p158_p2), 131072   ;;  %vm366_vm5 = vcmask (!%p158_p2), 1040384   ;;  %vm452_vm6 = vcmask (!%p158_p2), 57344  }
   0x7   : > { %600 = vmatprep.subr.bf16.mxu1 (!%p158_p2), %v635_v0  ;;  %587 = vmatprep.mubr.msk.f32.mxu1 (!%p158_p2), %vm636_vm0, %v637_v1 }
   0xd   : > { %s723_s13 = smov (!%p191_p3, %s533_s13), 7 }
   0xe   : > { %s670_s14 = smul.u32 24, %s723_s13 }
  0x10   : > { %s200_s17 = scalar_lea.vmem %s719_s1, %s670_s14  ;;  %s195_s20 = scalar_lea.vmem %s718_s0, %s670_s14 }
  0x11   : > { %v214_v2 = vld [vmem:[%s200_s17] sm:$0xff]  ;;  %v215_v3 = vld [vmem:[%s200_s17 + $0x8] sm:$0xff]  ;;  %v216_v5 = vld [vmem:[%s200_s17 + $0x10] sm:$0x1]  ;;  %s205_s23 = scalar_lea.vmem %s720_s2, %s670_s14  ;;  %s210_s26 = scalar_lea.vmem %s721_s3, %s670_s14 }
  0x12   : > { %v597_v4 = vpack.c.bf16 %v215_v3, %v214_v2  ;;  %v211_v6 = vld [vmem:[%s195_s20] sm:$0xff]  ;;  %v212_v7 = vld [vmem:[%s195_s20 + $0x8] sm:$0xff]  ;;  %v213_v8 = vld [vmem:[%s195_s20 + $0x10] sm:$0x1] }
  0x13   : > { %v217_v36 = vld [vmem:[%s205_s23] sm:$0xff]  ;;  %v218_v37 = vld [vmem:[%s205_s23 + $0x8] sm:$0xff]  ;;  %v219_v39 = vld [vmem:[%s205_s23 + $0x10] sm:$0x1] }
  0x14   : > { %599 = vmatpush3.bf16.xpose.msk.msra.mxu0 %vm598_vm2, %v597_v4  ;;  %v601_v38 = vpack.c.bf16 %v218_v37, %v217_v36 }
  0x15   : > { %570 = vmatprep.subr.mxu0 %v637_v1 }
  0x16   : > { %602 = vmatpush3.bf16.msra.mxu1 %v601_v38 }
  0x17   : > { %585 = vmatprep.subr.mxu1 %v637_v1 }
  0x1a   : > { %586 = vmatpush3.msk.msra.mxu1 %vm366_vm5, %v219_v39 }
  0x1c   : > { %571 = vmatpush3.xpose.msk.msra.mxu0 %vm220_vm1, %v216_v5 }
  0x1f   : > { %573 = vmatmul.mubr.msk.f32.vlgmr.msra.gmra.mrb[0].mxu0 %vm220_vm1, %v211_v6 }
  0x20   : > { %575 = vmatprep.mubr.msk.f32.mxu0 %vm636_vm0, %v637_v1 }
  0x23   : > { %576 = vmatmul.mubr.msk.f32.gmra.mrb[2].mxu0 %vm220_vm1, %v212_v7 }
  0x24   : > { %578 = vmatprep.mubr.msk.f32.mxu0 %vm636_vm0, %v637_v1 }
  0x27   : > { %579 = vmatmul.mubr.msk.f32.gmra.mrb[4].mxu0 %vm220_vm1, %v213_v8 }
  0xf2   : > { %v305_v9 = vpop.f32.mrb[0].mxu0 }
  0xf3   : > { %v319_v10 = vmul.f32 0.35355338, %v305_v9  ;;  %v574_v11 = vpop.f32.mrb[1].mxu0 }
  0xf5   : > { %v323_v12 = vsel %vm322_vm3, %v319_v10, -inf }
  0xf6   : > { %324 = vmax.xlane.f32.xlu0 %v323_v12  ;;  %v310_v13 = vpop.f32.mrb[2].mxu0 }
  0xf7   : > { %v320_v14 = vmul.f32 0.35355338, %v310_v13  ;;  %v577_v15 = vpop.f32.mrb[3].mxu0 }
  0xf9   : > { %v326_v16 = vsel %vm322_vm3, %v320_v14, -inf }
  0xfa   : > { %327 = vmax.xlane.f32.xlu0 %v326_v16  ;;  %v315_v17 = vpop.f32.mrb[4].mxu0 }
  0xfb   : > { %v321_v18 = vmul.f32 0.35355338, %v315_v17  ;;  %v580_v19 = vpop.f32.mrb[5].mxu0 }
  0xfd   : > { %v330_v20 = vsel %vm329_vm4, %v321_v18, -inf }
  0xfe   : > { %331 = vmax.xlane.f32.xlu1 %v330_v20 }
 0x183   : > { %v325_v21 = vpop.xlane.xlu0 %324 }
 0x184   : > { %v333_v22 = vsub.f32 %v319_v10, %v325_v21 }
 0x186   : > { %v336_v23 = vmul.f32 1.442695, %v333_v22 }
 0x187   : > { %v328_v24 = vpop.xlane.xlu0 %327 }
 0x188   : > { %615 = vpow2.f32 %v336_v23  ;;  %v334_v25 = vsub.f32 %v320_v14, %v328_v24 }
 0x18a   : > { %v338_v26 = vmul.f32 1.442695, %v334_v25 }
 0x18b   : > { %v332_v27 = vpop.xlane.xlu1 %331 }
 0x18c   : > { %617 = vpow2.f32 %v338_v26  ;;  %v335_v28 = vsub.f32 %v321_v18, %v332_v27 }
 0x18e   : > { %v340_v29 = vmul.f32 1.442695, %v335_v28 }
 0x190   : > { %619 = vpow2.f32 %v340_v29 }
 0x192   : > { %v616_v30 = vpop.eup %615 }
 0x193   : > { %v342_v31 = vsel %vm322_vm3, %v616_v30, 0.0 }
 0x194   : > { %343 = vadd.xlane.f32.xlu1 %v342_v31 }
 0x196   : > { %v618_v32 = vpop.eup %617 }
 0x197   : > { %v345_v33 = vsel %vm322_vm3, %v618_v32, 0.0 }
 0x198   : > { %346 = vadd.xlane.f32.xlu0 %v345_v33 }
 0x19a   : > { %v620_v34 = vpop.eup %619 }
 0x19b   : > { %v348_v35 = vsel %vm329_vm4, %v620_v34, 0.0 }
 0x19c   : > { %349 = vadd.xlane.f32.xlu1 %v348_v35 }
 0x221   : > { %v344_v40 = vpop.xlane.xlu1 %343 }
 0x222   : > { %621 = vrcp.f32 %v344_v40 }
 0x225   : > { %v347_v41 = vpop.xlane.xlu0 %346 }
 0x226   : > { %623 = vrcp.f32 %v347_v41 }
 0x229   : > { %v350_v42 = vpop.xlane.xlu1 %349 }
 0x22a   : > { %625 = vrcp.f32 %v350_v42 }
 0x22c   : > { %v622_v43 = vpop.eup %621 }
 0x22d   : > { %v352_v44 = vmul.f32 %v622_v43, %v616_v30 }
 0x22f   : > { %588 = vmatmul.mubr.msk.f32.vlgmr.msra.gmra.mrb[0].mxu1 %vm322_vm3, %v352_v44 }
 0x230   : > { %v624_v45 = vpop.eup %623  ;;  %590 = vmatprep.mubr.msk.f32.mxu1 %vm636_vm0, %v637_v1 }
 0x231   : > { %v354_v46 = vmul.f32 %v624_v45, %v618_v32 }
 0x233   : > { %591 = vmatmul.mubr.msk.f32.gmra.mrb[2].mxu1 %vm322_vm3, %v354_v46 }
 0x234   : > { %v626_v47 = vpop.eup %625  ;;  %593 = vmatprep.mubr.msk.f32.mxu1 %vm636_vm0, %v637_v1 }
 0x235   : > { %v356_v48 = vmul.f32 %v626_v47, %v620_v34 }
 0x237   : > { %594 = vmatmul.mubr.msk.f32.gmra.mrb[4].mxu1 %vm322_vm3, %v356_v48 }
 0x302   : > { %v436_v49 = vpop.f32.mrb[0].mxu1 }
 0x303   : > { %450 = vst.msk [vmem:[%s210_s26] sm:$0xff] %vm220_vm1, %v436_v49  ;;  %v589_v50 = vpop.f32.mrb[1].mxu1 }
 0x306   : > { %v441_v51 = vpop.f32.mrb[2].mxu1 }
 0x307   : > { %451 = vst.msk [vmem:[%s210_s26 + $0x8] sm:$0xff] %vm220_vm1, %v441_v51  ;;  %v592_v52 = vpop.f32.mrb[3].mxu1 }
 0x30a   : > { %v446_v53 = vpop.f32.mrb[4].mxu1 }
 0x30b   : > { %453 = vst.msk [vmem:[%s210_s26 + $0x10] sm:$0x1] %vm452_vm6, %v446_v53  ;;  %v595_v54 = vpop.f32.mrb[5].mxu1 }
 0x30c PF: > { %s13_s12 = sadd.s32 1, %s633_s12  }
 0x30d   : > { %p10_p4 = scmp.ge.s32.totalorder %s13_s12, 10  }
 0x30f   :  { %12 = sbr.rel (!%p10_p4) target bundleno = 1 (0x1), region = 68 }

// kernel: vit_forward.23
= control target key start
LH: loop header
LB: loop body
LE: loop exit
PB: predicated region body
PF: predicated region fallthrough
CT: control target
= control target key end

     0   :  { %v251_v0 = vmov 0.0|0.0   ;;  %vm252_vm0 = vmmov 0   ;;  %v253_v6 = vmov 0.0   ;;  %vm30_vm1 = vcmask 261120   ;;  %s324_s1 = inlined_call_operand.vmem [shape: f32[32,128], index: 1, kind: input, shape index: {}]   ;;  %s325_s0 = inlined_call_operand.vmem [shape: f32[34,32], index: 0, kind: input, shape index: {}]   ;;  %s326_s2 = inlined_call_operand.vmem [shape: f32[1,128], index: 2, kind: input, shape index: {}]   ;;  %s327_s3 = inlined_call_operand.vmem [shape: f32[34,128], index: 3, kind: output, shape index: {}]  }
   0x1   :  { %228 = vmatprep.subr.bf16.mxu0 %v251_v0  ;;  %234 = vmatprep.subr.bf16.mxu1 %v251_v0  ;;  %v19_v1 = vld [vmem:[%s324_s1] sm:$0xff]  ;;  %v20_v2 = vld [vmem:[%s324_s1 + $0x8] sm:$0xff]  ;;  %v21_v3 = vld [vmem:[%s324_s1 + $0x10] sm:$0xff] }
   0x2   :  { %v229_v4 = vpack.c.bf16 %v20_v2, %v19_v1  ;;  %v22_v5 = vld [vmem:[%s324_s1 + $0x18] sm:$0xff]  ;;  %213 = vmatprep.mubr.msk.f32.mxu0 %vm252_vm0, %v253_v6  ;;  %222 = vmatprep.mubr.msk.f32.mxu1 %vm252_vm0, %v253_v6  ;;  %v14_v8 = vld [vmem:[%s325_s0] sm:$0xff]  ;;  %v15_v10 = vld [vmem:[%s325_s0 + $0x8] sm:$0xff] }
   0x3   :  { %v232_v7 = vpack.c.bf16 %v22_v5, %v21_v3  ;;  %v17_v9 = vld [vmem:[%s325_s0 + $0x18] sm:$0xff]  ;;  %v18_v11 = vld [vmem:[%s325_s0 + $0x20] sm:$0x3]  ;;  %v16_v12 = vld [vmem:[%s325_s0 + $0x10] sm:$0xff] }
   0x4   :  { %230 = vmatpush3.bf16.msra.mxu0 %v229_v4  ;;  %236 = vmatpush3.bf16.msra.mxu1 %v229_v4  ;;  %v190_v13 = vld [vmem:[%s326_s2] ss:$0 sm:$0xff] }
   0x5   :  { %231 = vmatprep.subr.bf16.mxu0 %v251_v0  ;;  %235 = vmatprep.subr.bf16.mxu1 %v251_v0 }
   0x8   :  { %233 = vmatpush3.bf16.msra.mxu0 %v232_v7  ;;  %237 = vmatpush3.bf16.msra.mxu1 %v232_v7 }
   0xb   :  { %214 = vmatmul.mubr.msk.f32.vlgmr.msra.gmra.mrb[0].mxu0 %vm30_vm1, %v14_v8  ;;  %223 = vmatmul.mubr.msk.f32.vlgmr.msra.gmra.mrb[0].mxu1 %vm30_vm1, %v17_v9 }
   0xc   :  { %216 = vmatprep.mubr.msk.f32.mxu0 %vm252_vm0, %v253_v6  ;;  %225 = vmatprep.mubr.msk.f32.mxu1 %vm252_vm0, %v253_v6 }
   0xf   :  { %217 = vmatmul.mubr.msk.f32.gmra.mrb[2].mxu0 %vm30_vm1, %v15_v10  ;;  %226 = vmatmul.mubr.msk.f32.gmra.mrb[2].mxu1 %vm30_vm1, %v18_v11 }
  0x10   :  { %219 = vmatprep.mubr.msk.f32.mxu0 %vm252_vm0, %v253_v6 }
  0x13   :  { %220 = vmatmul.mubr.msk.f32.gmra.mrb[4].mxu0 %vm30_vm1, %v16_v12 }
  0xde   :  { %v112_v14 = vpop.f32.mrb[0].mxu0  ;;  %v127_v15 = vpop.f32.mrb[0].mxu1 }
  0xdf   :  { %v113_v16 = vadd.f32 %v190_v13, %v112_v14  ;;  %v128_v17 = vadd.f32 %v190_v13, %v127_v15  ;;  %v215_v18 = vpop.f32.mrb[1].mxu0  ;;  %v224_v19 = vpop.f32.mrb[1].mxu1 }
  0xe1   :  { %v141_v20 = vmul.f32 0.044715, %v113_v16  ;;  %v144_v21 = vmul.f32 0.044715, %v128_v17  ;;  %v136_v56 = vmul.f32 0.5, %v113_v16  ;;  %v139_v58 = vmul.f32 0.5, %v128_v17 }
  0xe2   :  { %v117_v22 = vpop.f32.mrb[2].mxu0  ;;  %v132_v23 = vpop.f32.mrb[2].mxu1 }
  0xe3   :  { %v146_v24 = vmul.f32 %v141_v20, %v113_v16  ;;  %v149_v25 = vmul.f32 %v144_v21, %v128_v17  ;;  %v118_v26 = vadd.f32 %v190_v13, %v117_v22  ;;  %v133_v27 = vadd.f32 %v190_v13, %v132_v23  ;;  %v218_v28 = vpop.f32.mrb[3].mxu0  ;;  %v227_v29 = vpop.f32.mrb[3].mxu1 }
  0xe5   :  { %v151_v30 = vmul.f32 %v146_v24, %v113_v16  ;;  %v154_v31 = vmul.f32 %v149_v25, %v128_v17  ;;  %v142_v32 = vmul.f32 0.044715, %v118_v26  ;;  %v145_v33 = vmul.f32 0.044715, %v133_v27 }
  0xe6   :  { %v122_v34 = vpop.f32.mrb[4].mxu0  ;;  %v137_v0 = vmul.f32 0.5, %v118_v26  ;;  %v140_v2 = vmul.f32 0.5, %v133_v27 }
  0xe7   :  { %v156_v35 = vadd.f32 %v151_v30, %v113_v16  ;;  %v159_v36 = vadd.f32 %v154_v31, %v128_v17  ;;  %v147_v37 = vmul.f32 %v142_v32, %v118_v26  ;;  %v123_v38 = vadd.f32 %v190_v13, %v122_v34  ;;  %v221_v39 = vpop.f32.mrb[5].mxu0 }
  0xe8   :  { %v150_v40 = vmul.f32 %v145_v33, %v133_v27 }
  0xe9   :  { %v161_v41 = vmul.f32 0.7978846, %v156_v35  ;;  %v164_v42 = vmul.f32 0.7978846, %v159_v36  ;;  %v152_v43 = vmul.f32 %v147_v37, %v118_v26  ;;  %v143_v45 = vmul.f32 0.044715, %v123_v38 }
  0xea   :  { %v155_v44 = vmul.f32 %v150_v40, %v133_v27  ;;  %v138_v7 = vmul.f32 0.5, %v123_v38 }
  0xeb   :  { %241 = vtanh.f32 %v161_v41  ;;  %v157_v46 = vadd.f32 %v152_v43, %v118_v26  ;;  %v148_v48 = vmul.f32 %v143_v45, %v123_v38 }
  0xec   :  { %243 = vtanh.f32 %v164_v42  ;;  %v160_v47 = vadd.f32 %v155_v44, %v133_v27 }
  0xed   :  { %v162_v49 = vmul.f32 0.7978846, %v157_v46  ;;  %v153_v51 = vmul.f32 %v148_v48, %v123_v38 }
  0xee   :  { %v165_v50 = vmul.f32 0.7978846, %v160_v47 }
  0xef   :  { %245 = vtanh.f32 %v162_v49  ;;  %v158_v52 = vadd.f32 %v153_v51, %v123_v38 }
  0xf0   :  { %247 = vtanh.f32 %v165_v50 }
  0xf1   :  { %v163_v53 = vmul.f32 0.7978846, %v158_v52 }
  0xf3   :  { %249 = vtanh.f32 %v163_v53 }
  0xf5   :  { %v242_v54 = vpop.eup %241 }
  0xf6   :  { %v244_v55 = vpop.eup %243  ;;  %v171_v57 = vadd.f32 1.0, %v242_v54 }
  0xf7   :  { %v174_v59 = vadd.f32 1.0, %v244_v55 }
  0xf8   :  { %v176_v60 = vmul.f32 %v171_v57, %v136_v56 }
  0xf9   :  { %v246_v61 = vpop.eup %245  ;;  %v179_v62 = vmul.f32 %v174_v59, %v139_v58 }
  0xfa   :  { %v248_v63 = vpop.eup %247  ;;  %181 = vst [vmem:[%s327_s3] sm:$0xff] %v176_v60  ;;  %v172_v1 = vadd.f32 1.0, %v246_v61 }
  0xfb   :  { %184 = vst [vmem:[%s327_s3 + $0x18] sm:$0xff] %v179_v62  ;;  %v175_v3 = vadd.f32 1.0, %v248_v63 }
  0xfc   :  { %v177_v4 = vmul.f32 %v172_v1, %v137_v0 }
  0xfd   :  { %v180_v5 = vmul.f32 %v175_v3, %v140_v2  ;;  %v250_v6 = vpop.eup %249 }
  0xfe   :  { %182 = vst [vmem:[%s327_s3 + $0x8] sm:$0xff] %v177_v4  ;;  %v173_v8 = vadd.f32 1.0, %v250_v6 }
  0xff   :  { %185 = vst [vmem:[%s327_s3 + $0x20] sm:$0x3] %v180_v5 }
 0x100   :  { %v178_v9 = vmul.f32 %v173_v8, %v138_v7 }
 0x102   :  { %183 = vst [vmem:[%s327_s3 + $0x10] sm:$0xff] %v178_v9 }

// kernel: vit_forward.24
= control target key start
LH: loop header
LB: loop body
LE: loop exit
PB: predicated region body
PF: predicated region fallthrough
CT: control target
= control target key end

     0   :  { %v268_v0 = vmov 0.0|0.0   ;;  %vm269_vm0 = vmmov 0   ;;  %v270_v6 = vmov 0.0   ;;  %vm145_vm1 = vcmask 261120   ;;  %s406_s1 = inlined_call_operand.vmem [shape: f32[128,32], index: 1, kind: input, shape index: {}]   ;;  %s407_s0 = inlined_call_operand.vmem [shape: f32[34,128], index: 0, kind: input, shape index: {}]   ;;  %s408_s2 = inlined_call_operand.vmem [shape: f32[1,32], index: 2, kind: input, shape index: {}]   ;;  %s409_s3 = inlined_call_operand.vmem [shape: f32[34,32], index: 3, kind: input, shape index: {}]   ;;  %s410_s4 = inlined_call_operand.vmem [shape: f32[34,32], index: 4, kind: output, shape index: {}]  }
   0x1   :  { %225 = vmatprep.subr.bf16.mxu0 %v268_v0  ;;  %v22_v1 = vld [vmem:[%s406_s1] sm:$0xff]  ;;  %v23_v2 = vld [vmem:[%s406_s1 + $0x8] sm:$0xff]  ;;  %249 = vmatprep.subr.bf16.mxu1 %v268_v0  ;;  %v24_v3 = vld [vmem:[%s406_s1 + $0x10] sm:$0xff]  ;;  %vm150_vm2 = vcmask 254976  }
   0x2   :  { %v226_v4 = vpack.c.bf16 %v23_v2, %v22_v1  ;;  %v25_v5 = vld [vmem:[%s406_s1 + $0x18] sm:$0xff]  ;;  %210 = vmatprep.mubr.msk.f32.mxu0 %vm269_vm0, %v270_v6  ;;  %219 = vmatprep.mubr.msk.f32.mxu1 %vm269_vm0, %v270_v6  ;;  %v26_v8 = vld [vmem:[%s406_s1 + $0x20] sm:$0xff]  ;;  %v27_v9 = vld [vmem:[%s406_s1 + $0x28] sm:$0xff] }
   0x3   :  { %v229_v7 = vpack.c.bf16 %v25_v5, %v24_v3  ;;  %v232_v10 = vpack.c.bf16 %v27_v9, %v26_v8  ;;  %v28_v11 = vld [vmem:[%s406_s1 + $0x30] sm:$0xff]  ;;  %v29_v12 = vld [vmem:[%s406_s1 + $0x38] sm:$0xff]  ;;  %v30_v14 = vld [vmem:[%s406_s1 + $0x40] sm:$0xff] }
   0x4   :  { %227 = vmatpush3.bf16.msra.mxu0 %v226_v4  ;;  %257 = vmatpush3.bf16.msra.mxu1 %v226_v4  ;;  %v235_v13 = vpack.c.bf16 %v29_v12, %v28_v11  ;;  %v31_v15 = vld [vmem:[%s406_s1 + $0x48] sm:$0xff]  ;;  %v32_v17 = vld [vmem:[%s406_s1 + $0x50] sm:$0xff]  ;;  %v33_v18 = vld [vmem:[%s406_s1 + $0x58] sm:$0xff] }
   0x5   :  { %228 = vmatprep.subr.bf16.mxu0 %v268_v0  ;;  %250 = vmatprep.subr.bf16.mxu1 %v268_v0  ;;  %v238_v16 = vpack.c.bf16 %v31_v15, %v30_v14  ;;  %v241_v19 = vpack.c.bf16 %v33_v18, %v32_v17  ;;  %v34_v20 = vld [vmem:[%s406_s1 + $0x60] sm:$0xff]  ;;  %v35_v21 = vld [vmem:[%s406_s1 + $0x68] sm:$0xff]  ;;  %v36_v23 = vld [vmem:[%s406_s1 + $0x70] sm:$0xff] }
   0x6   :  { %v244_v22 = vpack.c.bf16 %v35_v21, %v34_v20  ;;  %v37_v24 = vld [vmem:[%s406_s1 + $0x78] sm:$0xff]  ;;  %v17_v26 = vld [vmem:[%s407_s0] sm:$0xff]  ;;  %v18_v28 = vld [vmem:[%s407_s0 + $0x8] sm:$0xff] }
   0x7   :  { %v247_v25 = vpack.c.bf16 %v37_v24, %v36_v23  ;;  %v20_v27 = vld [vmem:[%s407_s0 + $0x18] sm:$0xff]  ;;  %v21_v29 = vld [vmem:[%s407_s0 + $0x20] sm:$0x3]  ;;  %v19_v30 = vld [vmem:[%s407_s0 + $0x10] sm:$0xff] }
   0x8   :  { %230 = vmatpush3.bf16.msra.mxu0 %v229_v7  ;;  %258 = vmatpush3.bf16.msra.mxu1 %v229_v7  ;;  %v156_v31 = vld [vmem:[%s408_s2] ss:$0 sm:$0xff]  ;;  %v138_v35 = vld [vmem:[%s409_s3 + $0x18] sm:$0xff]  ;;  %v136_v43 = vld [vmem:[%s409_s3 + $0x8] sm:$0xff] }
   0x9   :  { %231 = vmatprep.subr.bf16.mxu0 %v268_v0  ;;  %251 = vmatprep.subr.bf16.mxu1 %v268_v0  ;;  %v135_v33 = vld [vmem:[%s409_s3] sm:$0xff]  ;;  %v137_v53 = vld [vmem:[%s409_s3 + $0x10] sm:$0xff] }
   0xa   :  { %v139_v45 = vld [vmem:[%s409_s3 + $0x20] sm:$0x3] }
   0xc   :  { %233 = vmatpush3.bf16.msra.mxu0 %v232_v10  ;;  %259 = vmatpush3.bf16.msra.mxu1 %v232_v10 }
   0xd   :  { %234 = vmatprep.subr.bf16.mxu0 %v268_v0  ;;  %252 = vmatprep.subr.bf16.mxu1 %v268_v0 }
  0x10   :  { %236 = vmatpush3.bf16.msra.mxu0 %v235_v13  ;;  %260 = vmatpush3.bf16.msra.mxu1 %v235_v13 }
  0x11   :  { %237 = vmatprep.subr.bf16.mxu0 %v268_v0  ;;  %253 = vmatprep.subr.bf16.mxu1 %v268_v0 }
  0x14   :  { %239 = vmatpush3.bf16.msra.mxu0 %v238_v16  ;;  %261 = vmatpush3.bf16.msra.mxu1 %v238_v16 }
  0x15   :  { %240 = vmatprep.subr.bf16.mxu0 %v268_v0  ;;  %254 = vmatprep.subr.bf16.mxu1 %v268_v0 }
  0x18   :  { %242 = vmatpush3.bf16.msra.mxu0 %v241_v19  ;;  %262 = vmatpush3.bf16.msra.mxu1 %v241_v19 }
  0x19   :  { %243 = vmatprep.subr.bf16.mxu0 %v268_v0  ;;  %255 = vmatprep.subr.bf16.mxu1 %v268_v0 }
  0x1c   :  { %245 = vmatpush3.bf16.msra.mxu0 %v244_v22  ;;  %263 = vmatpush3.bf16.msra.mxu1 %v244_v22 }
  0x1d   :  { %246 = vmatprep.subr.bf16.mxu0 %v268_v0  ;;  %256 = vmatprep.subr.bf16.mxu1 %v268_v0 }
  0x20   :  { %248 = vmatpush3.bf16.msra.mxu0 %v247_v25  ;;  %264 = vmatpush3.bf16.msra.mxu1 %v247_v25 }
  0x23   :  { %211 = vmatmul.mubr.f32.vlgmr.msra.gmra.mrb[0].mxu0 %v17_v26  ;;  %220 = vmatmul.mubr.f32.vlgmr.msra.gmra.mrb[0].mxu1 %v20_v27 }
  0x24   :  { %213 = vmatprep.mubr.msk.f32.mxu0 %vm269_vm0, %v270_v6  ;;  %222 = vmatprep.mubr.msk.f32.mxu1 %vm269_vm0, %v270_v6 }
  0x27   :  { %214 = vmatmul.mubr.f32.gmra.mrb[2].mxu0 %v18_v28  ;;  %223 = vmatmul.mubr.f32.gmra.mrb[2].mxu1 %v21_v29 }
  0x28   :  { %216 = vmatprep.mubr.msk.f32.mxu0 %vm269_vm0, %v270_v6 }
  0x2b   :  { %217 = vmatmul.mubr.f32.gmra.mrb[4].mxu0 %v19_v30 }
  0xf6   :  { %v111_v32 = vpop.f32.mrb[0].mxu0  ;;  %v126_v34 = vpop.f32.mrb[0].mxu1 }
  0xf7   :  { %v112_v36 = vadd.f32 %v156_v31, %v111_v32  ;;  %v212_v37 = vpop.f32.mrb[1].mxu0  ;;  %v127_v38 = vadd.f32 %v156_v31, %v126_v34  ;;  %v221_v39 = vpop.f32.mrb[1].mxu1 }
  0xf9   :  { %v140_v40 = vadd.f32 %v135_v33, %v112_v36  ;;  %v143_v41 = vadd.f32 %v138_v35, %v127_v38 }
  0xfa   :  { %v116_v42 = vpop.f32.mrb[2].mxu0  ;;  %v131_v44 = vpop.f32.mrb[2].mxu1 }
  0xfb   :  { %146 = vst.msk [vmem:[%s410_s4] sm:$0xff] %vm145_vm1, %v140_v40  ;;  %149 = vst.msk [vmem:[%s410_s4 + $0x18] sm:$0xff] %vm145_vm1, %v143_v41  ;;  %v117_v46 = vadd.f32 %v156_v31, %v116_v42  ;;  %v215_v47 = vpop.f32.mrb[3].mxu0  ;;  %v132_v48 = vadd.f32 %v156_v31, %v131_v44  ;;  %v224_v49 = vpop.f32.mrb[3].mxu1 }
  0xfd   :  { %v141_v50 = vadd.f32 %v136_v43, %v117_v46  ;;  %v144_v51 = vadd.f32 %v139_v45, %v132_v48 }
  0xfe   :  { %v121_v52 = vpop.f32.mrb[4].mxu0 }
  0xff   :  { %147 = vst.msk [vmem:[%s410_s4 + $0x8] sm:$0xff] %vm145_vm1, %v141_v50  ;;  %v122_v54 = vadd.f32 %v156_v31, %v121_v52  ;;  %v218_v55 = vpop.f32.mrb[5].mxu0 }
 0x100   :  { %151 = vst.msk [vmem:[%s410_s4 + $0x20] sm:$0x3] %vm150_vm2, %v144_v51 }
 0x101   :  { %v142_v56 = vadd.f32 %v137_v53, %v122_v54 }
 0x103   :  { %148 = vst.msk [vmem:[%s410_s4 + $0x10] sm:$0xff] %vm145_vm1, %v142_v56 }

// kernel: vit_forward.33
= control target key start
LH: loop header
LB: loop body
LE: loop exit
PB: predicated region body
PF: predicated region fallthrough
CT: control target
= control target key end

     0   :  { %v169_v3 = vmov 0.0|0.0   ;;  %vm170_vm0 = vmmov 0   ;;  %v171_v6 = vmov 0.0   ;;  %s223_s0 = inlined_call_operand.vmem [shape: f32[2,32], index: 0, kind: input, shape index: {}]   ;;  %s224_s1 = inlined_call_operand.vmem [shape: f32[32,10], index: 1, kind: input, shape index: {}]   ;;  %s225_s2 = inlined_call_operand.vmem [shape: f32[1,10], index: 2, kind: input, shape index: {}]   ;;  %s226_s3 = inlined_call_operand.hbm [shape: f32[2,10], index: 3, kind: output, shape index: {}]  }
   0x1   :  { %v16_v0 = vld [vmem:[%s224_s1] sm:$0xff]  ;;  %v17_v1 = vld [vmem:[%s224_s1 + $0x8] sm:$0xff]  ;;  %v18_v2 = vld [vmem:[%s224_s1 + $0x10] sm:$0xff]  ;;  %135 = vmatprep.subr.bf16.mxu0 %v169_v3  ;;  %132 = vmatprep.mubr.msk.f32.mxu0 %vm170_vm0, %v171_v6 }
   0x2   :  { %v136_v4 = vpack.c.bf16 %v17_v1, %v16_v0  ;;  %v19_v5 = vld [vmem:[%s224_s1 + $0x18] sm:$0xff] }
   0x3   :  { %8 = vsyncpa [#allocation3], 0  ;;  %v139_v7 = vpack.c.bf16 %v19_v5, %v18_v2  ;;  %v15_v8 = vld [vmem:[%s223_s0] sm:$0x3]  ;;  %vm27_vm1 = vcmask 261120   ;;  %s172_s24 = smov [#allocation2]  }
   0x4   :  { %137 = vmatpush3.bf16.msra.mxu0 %v136_v4  ;;  %v117_v9 = vld [vmem:[%s225_s2] ss:$0 sm:$0xff]  ;;  %s109_s1 = sshll.u32 %s172_s24, 4  ;;  %vm101_vm2 = vcmask 74752   ;;  %s110_s1 = int_to_ptr.vmem [resolvable:$true] %s109_s1 }
   0x5   :  { %138 = vmatprep.subr.bf16.mxu0 %v169_v3  ;;  %s145_s25 = scalar_lea.vmem %s110_s1, 32  ;;  %p150_p1 = scmp.lt.s32.totalorder %s110_s1, %s110_s1 }
   0x6   :  { %p146_p0 = scmp.ne.s32.totalorder %s110_s1, %s145_s25  ;;  %p151_p2 = scmp.lt.s32.totalorder %s145_s25, %s145_s25 }
   0x8   :  { %140 = vmatpush3.bf16.msra.mxu0 %v139_v7  ;;  %p152_p3 = por %p151_p2, %p150_p1 }
   0xa   :  { %p153_p4 = pnand %p152_p3, %p146_p0 }
   0xb   :  { %133 = vmatmul.mubr.msk.f32.vlgmr.msra.gmra.mrb[0].mxu0 %vm27_vm1, %v15_v8 }
  0xde   :  { %v97_v10 = vpop.f32.mrb[0].mxu0 }
  0xdf   :  { %v98_v11 = vadd.f32 %v117_v9, %v97_v10  ;;  %v134_v12 = vpop.f32.mrb[1].mxu0 }
  0xe1   :  { %102 = vst.msk [vmem:[#allocation2] sm:$0x3] %vm101_vm2, %v98_v11 }
  0xe2   :  { %156 = shalt.err (!%p153_p4)
}
  0xe3   :  { %s157_s27 = scalar_lea.hbm %s226_s3, 32 }
  0xe4   :  { %p158_p5 = scmp.ne.s32.totalorder %s226_s3, %s157_s27  ;;  %p161_p6 = scmp.lt.u32.totalorder %s157_s27, %s226_s3 }
  0xe6   :  { %p163_p7 = pnand %p161_p6, %p158_p5 }
  0xe8   :  { %166 = shalt.err (!%p163_p7)
}
  0xe9   :  { %112 = dma.vmem_to_hbm [thread:$0]  %s110_s1, 32, %s226_s3, [#allocation3]  }
  0xea   :  { %167 = dma.done.wait [#allocation3], 32  }
  0xeb   :  { %168 = vsyncadd [#allocation3], 4294967264 }
  0xec   :  { %116 = vsyncpa [#allocation3], 1 }

</bundles_post_ra>
